<compile_context>
chip_gen: v7x
topology: tpu7x:2x2x1
jax: 0.10.0
libtpu: 0.0.40
codegen_flags: <defaults>
</compile_context>

<pallas_src>
import math

import jax
import jax.numpy as jnp
from jax.experimental import pallas as pl
from jax.experimental.pallas import tpu as pltpu

C_OUT = 64        # conv1 out channels
H1 = 256          # fc1 out features
N_OUT_PAD = 128   # lane-dense fc2 output width (real output is column 0)


def _round_up(x, m):
    return ((x + m - 1) // m) * m


# --------------------------------------------------------------------------
# Kernel
# --------------------------------------------------------------------------
def _cnn1d_kernel(x_ref, wc_ref, bc_ref, w1_ref, b1_ref, w2_ref, b2_ref, o_ref):
    """One batch tile (TB rows) per grid step; pure MXU matmul chain.

    x_ref : (TB, Kin)      bf16, flattened zero-padded input (position-major)
    wc_ref: (Kin, 2*Fp)    bf16, banded conv weight [even-pos cols | odd-pos cols]
    bc_ref: (1, 2*Fp)      f32,  conv bias tiled per position (0 in pad columns)
    w1_ref: (Fp, 256)      bf16, fc1 weight permuted to position-major order
    b1_ref: (1, 256)       f32
    w2_ref: (256, 128)     bf16, fc2 weight zero-padded to a lane-dense width
    b2_ref: (1, 128)       f32
    o_ref : (TB, 128)      f32, real result in column 0
    """
    Fp = w1_ref.shape[0]

    # Conv1d(k=3, pad=1) for every output position at once, fused bias + ReLU.
    y = jnp.dot(x_ref[...], wc_ref[...], preferred_element_type=jnp.float32)
    y = jnp.maximum(y + bc_ref[...], 0.0)                    # (TB, 2*Fp)

    # MaxPool1d(k=2): even half vs odd half.  Fp % 128 == 0 -> lane-aligned,
    # pure VPU max; result is already the flattened fc1 input.
    pooled = jnp.maximum(y[:, :Fp], y[:, Fp:])               # (TB, Fp)

    # fc1 + ReLU (single matmul).
    h = jnp.dot(pooled.astype(w1_ref.dtype), w1_ref[...],
                preferred_element_type=jnp.float32)
    h = jnp.maximum(h + b1_ref[...], 0.0)                    # (TB, 256)

    # fc2, lane-dense 128-wide output (column 0 is the real value).
    o_ref[...] = jnp.dot(h.astype(w2_ref.dtype), w2_ref[...],
                         preferred_element_type=jnp.float32) + b2_ref[...]


# --------------------------------------------------------------------------
# One-time parameter preparation (cache/reuse across forward calls)
# --------------------------------------------------------------------------
def prepare_kernel_params(params, lookback):
    """Build the kernel-side weight layout once per parameter set (scatter-free)."""
    Wc, bc, W1, b1, W2, b2 = params          # torch-layout parameters
    Cout, Cin, K = Wc.shape
    L = lookback
    assert Cout == C_OUT and K == 3 and L % 2 == 0
    F = (L // 2) * C_OUT
    Fp = _round_up(F, 128)                   # lane-aligned pooled width
    pad = Fp - F
    Kin = (L + 2) * Cin

    # Banded conv weight: band[l, (l+k)*Cin + ci, o] = Wc[o, ci, k], built with
    # the pad/flatten/truncate diagonal trick (no trace-time scatter loop).
    tap = jnp.transpose(Wc, (2, 1, 0)).reshape(3 * Cin, Cout)        # (3Cin, Cout)
    row = jnp.pad(tap, ((0, Kin + Cin - 3 * Cin), (0, 0)))           # (Kin+Cin, Cout)
    band = jnp.broadcast_to(row, (L, Kin + Cin, Cout))
    band = band.reshape(L * (Kin + Cin), Cout)[: L * Kin]
    band = band.reshape(L, Kin, Cout)                                # (L, Kin, Cout)
    band = jnp.transpose(band, (1, 0, 2))                            # (Kin, L, Cout)

    # Even/odd position halves, each padded out to Fp columns.
    w_even = jnp.pad(band[:, 0::2, :].reshape(Kin, F), ((0, 0), (0, pad)))
    w_odd = jnp.pad(band[:, 1::2, :].reshape(Kin, F), ((0, 0), (0, pad)))
    wc_big = jnp.concatenate([w_even, w_odd], axis=1)                # (Kin, 2*Fp)

    b_half = jnp.pad(jnp.tile(bc, L // 2), (0, pad))                 # (Fp,)
    bc_big = jnp.concatenate([b_half, b_half]).reshape(1, 2 * Fp)

    # fc1: torch flatten index f = c*(L//2) + p -> pooled column p*64 + c.
    w1_mat = jnp.transpose(W1.reshape(H1, C_OUT, L // 2), (2, 1, 0)).reshape(F, H1)
    w1_mat = jnp.pad(w1_mat, ((0, pad), (0, 0)))                     # (Fp, H1)

    # fc2: pad N=1 -> 128 so the kernel output is lane-dense.
    w2_pad = jnp.pad(W2.T, ((0, 0), (0, N_OUT_PAD - 1)))             # (H1, 128)
    b2_pad = jnp.pad(b2.reshape(1, 1), ((0, 0), (0, N_OUT_PAD - 1)))

    # bf16 matmul operands (accumulation stays f32 in the kernel), f32 biases.
    return dict(
        wc=wc_big.astype(jnp.bfloat16),
        bc=bc_big.astype(jnp.float32),
        w1=w1_mat.astype(jnp.bfloat16),
        b1=b1.reshape(1, H1).astype(jnp.float32),
        w2=w2_pad.astype(jnp.bfloat16),
        b2=b2_pad.astype(jnp.float32),
        L=L, Cin=Cin, Fp=Fp, Kin=Kin,
    )


# --------------------------------------------------------------------------
# Forward wrapper
# --------------------------------------------------------------------------
def cnn1d_forward(x, kparams, *, max_batch_tile=512):
    """x: (B, C_in, L) float32 (PyTorch NCW). Returns (B, 1) float32."""
    B, Cin, L = x.shape
    assert Cin == kparams["Cin"] and L == kparams["L"]
    Kin, Fp = kparams["Kin"], kparams["Fp"]

    # Position-major flatten of the zero-padded input, cast to bf16.
    x_pad = jnp.pad(x, ((0, 0), (0, 0), (1, 1)))                     # (B, Cin, L+2)
    x_flat = jnp.transpose(x_pad, (0, 2, 1)).reshape(B, Kin).astype(jnp.bfloat16)

    # Batch tile: >=2 grid steps for small/medium batches (feeds both v7x
    # TensorCores via the "parallel" axis), 16-row bf16-sublane alignment,
    # capped so large batches stream in fixed-size tiles.
    SUB = 16
    if B >= 2 * max_batch_tile:
        TB = max_batch_tile
    else:
        TB = min(max_batch_tile, max(SUB, _round_up((B + 1) // 2, SUB)))
    B_pad = _round_up(B, TB)
    if B_pad != B:
        x_flat = jnp.pad(x_flat, ((0, B_pad - B), (0, 0)))

    # TODO(synk): the banded conv weight scales O(L^2 * Cin * 64); once it no
    # longer fits single-buffered in VMEM, switch to an im2col matmul
    # ((TB*L, 3*Cin) @ (3*Cin, 64)) or tile the 2*Fp output axis on a second
    # grid dimension.  Fine for this model's small lookbacks.

    flops = 2 * B_pad * (Kin * 2 * Fp + Fp * H1 + H1 * N_OUT_PAD)
    bytes_accessed = (2 * (B_pad * Kin + Kin * 2 * Fp + Fp * H1 + H1 * N_OUT_PAD)
                      + 4 * (2 * Fp + H1 + N_OUT_PAD + B_pad * N_OUT_PAD))

    # Explicit VMEM budget: single-buffered weights + double-buffered x/out
    # tiles + f32 temporaries (the scoped default is only 16/32 MiB).
    weight_b = (2 * (Kin * 2 * Fp + Fp * H1 + H1 * N_OUT_PAD)
                + 4 * (2 * Fp + H1 + N_OUT_PAD))
    stream_b = 2 * TB * Kin * 2 + 2 * TB * N_OUT_PAD * 4
    tmp_b = 4 * TB * (2 * Fp + 2 * Fp + H1 + N_OUT_PAD)
    vmem_limit = int(min(100 * 1024 * 1024,
                         max(32 * 1024 * 1024,
                             int(1.5 * (weight_b + stream_b + tmp_b)))))

    kp = kparams

    def run(single_buffer_weights):
        def const_spec(shape):
            idx = lambda b, _s=shape: (0,) * len(_s)
            if single_buffer_weights:
                # Grid-invariant operand: one resident buffer is enough.
                return pl.BlockSpec(shape, idx, pipeline_mode=pl.Buffered(1))
            return pl.BlockSpec(shape, idx)

        return pl.pallas_call(
            _cnn1d_kernel,
            out_shape=jax.ShapeDtypeStruct((B_pad, N_OUT_PAD), jnp.float32),
            grid=(B_pad // TB,),
            in_specs=[
                pl.BlockSpec((TB, Kin), lambda b: (b, 0)),
                const_spec((Kin, 2 * Fp)),
                const_spec((1, 2 * Fp)),
                const_spec((Fp, H1)),
                const_spec((1, H1)),
                const_spec((H1, N_OUT_PAD)),
                const_spec((1, N_OUT_PAD)),
            ],
            out_specs=pl.BlockSpec((TB, N_OUT_PAD), lambda b: (b, 0)),
            compiler_params=pltpu.CompilerParams(
                dimension_semantics=("parallel",),
                vmem_limit_bytes=vmem_limit),
            cost_estimate=pl.CostEstimate(flops=flops, transcendentals=0,
                                          bytes_accessed=bytes_accessed),
        )(x_flat, kp["wc"], kp["bc"], kp["w1"], kp["b1"], kp["w2"], kp["b2"])

    try:
        out = run(True)
    except Exception:
        # pipeline_mode=pl.Buffered(1) unsupported on this jax version; the
        # default double-buffered path is functionally identical.
        out = run(False)

    return out[:B, :1]


# --------------------------------------------------------------------------
# Pure-JAX reference (mirrors the PyTorch forward exactly, f32)
# --------------------------------------------------------------------------
def ref_forward(x, params):
    Wc, bc, W1, b1, W2, b2 = params
    B, Cin, L = x.shape
    xp = jnp.pad(x, ((0, 0), (0, 0), (1, 1)))                 # (B, Cin, L+2)
    y = jnp.zeros((B, C_OUT, L), jnp.float32)
    for k in range(3):
        y = y + jnp.einsum('oi,bil->bol', Wc[:, :, k], xp[:, :, k:k + L])
    y = jax.nn.relu(y + bc[None, :, None])                    # (B, 64, L)
    y = y.reshape(B, C_OUT, L // 2, 2).max(axis=-1)           # maxpool k=2
    y = y.reshape(B, C_OUT * (L // 2))                        # torch .view order
    y = jax.nn.relu(y @ W1.T + b1)
    return y @ W2.T + b2


def init_params(key, n_features, lookback):
    """Deterministic PyTorch-default-style init (uniform +/- 1/sqrt(fan_in))."""
    F = C_OUT * (lookback // 2)
    ks = jax.random.split(key, 6)

    def u(k, shape, fan_in):
        b = 1.0 / math.sqrt(fan_in)
        return jax.random.uniform(k, shape, jnp.float32, -b, b)

    Wc = u(ks[0], (C_OUT, n_features, 3), n_features * 3)
    bc = u(ks[1], (C_OUT,), n_features * 3)
    W1 = u(ks[2], (H1, F), F)
    b1 = u(ks[3], (H1,), F)
    W2 = u(ks[4], (1, H1), H1)
    b2 = u(ks[5], (1,), H1)
    return (Wc, bc, W1, b1, W2, b2)


if __name__ == "__main__":
    B, n_features, lookback = 2, 4, 16

    key = jax.random.PRNGKey(0)
    k_param, k_x = jax.random.split(key)
    params = init_params(k_param, n_features, lookback)
    x = jax.random.normal(k_x, (B, n_features, lookback), jnp.float32)

    # Build the kernel-side weight layout once; reuse across forward calls.
    kparams = prepare_kernel_params(params, lookback)

    out = jax.block_until_ready(cnn1d_forward(x, kparams))
    ref = jax.block_until_ready(ref_forward(x, params))

    assert out.shape == (B, 1), out.shape
    # bf16 matmul operands -> relaxed tolerance vs the f32 reference.
    assert jnp.allclose(out, ref, atol=3e-2, rtol=3e-2), (out, ref)
    print("KERNEL_OK")
</pallas_src>

<mosaic_0001>
module attributes {stable_mosaic.version = 11 : i64} {
  func.func @_cnn1d_kernel(%arg0: i32, %arg1: memref<16x72xbf16, #tpu.memory_space<vmem>>, %arg2: memref<72x1024xbf16, #tpu.memory_space<vmem>>, %arg3: memref<1x1024xf32, #tpu.memory_space<vmem>>, %arg4: memref<512x256xbf16, #tpu.memory_space<vmem>>, %arg5: memref<1x256xf32, #tpu.memory_space<vmem>>, %arg6: memref<256x128xbf16, #tpu.memory_space<vmem>>, %arg7: memref<1x128xf32, #tpu.memory_space<vmem>>, %arg8: memref<16x128xf32, #tpu.memory_space<vmem>>) attributes {dimension_semantics = [#tpu.dimension_semantics<parallel>], iteration_bounds = array<i64: 1>, scalar_prefetch = 0 : i64, scratch_operands = 0 : i64, tpu.core_type = #tpu.core_type<tc>, window_params = [{transform_indices = @transform_0, window_bounds = array<i64: 16, 72>}, {pipeline_mode = #tpu.pipeline_mode<synchronous>, transform_indices = @transform_1, window_bounds = array<i64: 72, 1024>}, {pipeline_mode = #tpu.pipeline_mode<synchronous>, transform_indices = @transform_2, window_bounds = array<i64: 1, 1024>}, {pipeline_mode = #tpu.pipeline_mode<synchronous>, transform_indices = @transform_3, window_bounds = array<i64: 512, 256>}, {pipeline_mode = #tpu.pipeline_mode<synchronous>, transform_indices = @transform_4, window_bounds = array<i64: 1, 256>}, {pipeline_mode = #tpu.pipeline_mode<synchronous>, transform_indices = @transform_5, window_bounds = array<i64: 256, 128>}, {pipeline_mode = #tpu.pipeline_mode<synchronous>, transform_indices = @transform_6, window_bounds = array<i64: 1, 128>}, {transform_indices = @transform_7, window_bounds = array<i64: 16, 128>}]} {
    %c0 = arith.constant 0 : index
    %c0_0 = arith.constant 0 : index
    %0 = vector.load %arg1[%c0, %c0_0] : memref<16x72xbf16, #tpu.memory_space<vmem>>, vector<16x72xbf16>
    %c0_1 = arith.constant 0 : index
    %c0_2 = arith.constant 0 : index
    %1 = vector.load %arg2[%c0_1, %c0_2] : memref<72x1024xbf16, #tpu.memory_space<vmem>>, vector<72x1024xbf16>
    %cst = arith.constant dense<0.000000e+00> : vector<16x1024xf32>
    %2 = tpu.matmul %0, %1, %cst {dimension_numbers = #tpu.dot_dimension_numbers<[1], [0], [0], [1], [0, 0, 1, 1], [], []>} : vector<16x72xbf16>, vector<72x1024xbf16>, vector<16x1024xf32> -> vector<16x1024xf32>
    %c0_3 = arith.constant 0 : index
    %c0_4 = arith.constant 0 : index
    %3 = vector.load %arg3[%c0_3, %c0_4] : memref<1x1024xf32, #tpu.memory_space<vmem>>, vector<1x1024xf32>
    %4 = vector.broadcast %3 : vector<1x1024xf32> to vector<16x1024xf32>
    %5 = arith.addf %2, %4 : vector<16x1024xf32>
    %cst_5 = arith.constant 0.000000e+00 : f32
    %6 = vector.broadcast %cst_5 : f32 to vector<16x1024xf32>
    %7 = arith.maximumf %5, %6 : vector<16x1024xf32>
    %8 = vector.extract_strided_slice %7 {offsets = [0, 0], sizes = [16, 512], strides = [1, 1]} : vector<16x1024xf32> to vector<16x512xf32>
    %9 = vector.extract_strided_slice %7 {offsets = [0, 512], sizes = [16, 512], strides = [1, 1]} : vector<16x1024xf32> to vector<16x512xf32>
    %10 = arith.maximumf %8, %9 : vector<16x512xf32>
    %11 = arith.truncf %10 : vector<16x512xf32> to vector<16x512xbf16>
    %c0_6 = arith.constant 0 : index
    %c0_7 = arith.constant 0 : index
    %12 = vector.load %arg4[%c0_6, %c0_7] : memref<512x256xbf16, #tpu.memory_space<vmem>>, vector<512x256xbf16>
    %cst_8 = arith.constant dense<0.000000e+00> : vector<16x256xf32>
    %13 = tpu.matmul %11, %12, %cst_8 {dimension_numbers = #tpu.dot_dimension_numbers<[1], [0], [0], [1], [0, 0, 1, 1], [], []>} : vector<16x512xbf16>, vector<512x256xbf16>, vector<16x256xf32> -> vector<16x256xf32>
    %c0_9 = arith.constant 0 : index
    %c0_10 = arith.constant 0 : index
    %14 = vector.load %arg5[%c0_9, %c0_10] : memref<1x256xf32, #tpu.memory_space<vmem>>, vector<1x256xf32>
    %15 = vector.broadcast %14 : vector<1x256xf32> to vector<16x256xf32>
    %16 = arith.addf %13, %15 : vector<16x256xf32>
    %cst_11 = arith.constant 0.000000e+00 : f32
    %17 = vector.broadcast %cst_11 : f32 to vector<16x256xf32>
    %18 = arith.maximumf %16, %17 : vector<16x256xf32>
    %19 = arith.truncf %18 : vector<16x256xf32> to vector<16x256xbf16>
    %c0_12 = arith.constant 0 : index
    %c0_13 = arith.constant 0 : index
    %20 = vector.load %arg6[%c0_12, %c0_13] : memref<256x128xbf16, #tpu.memory_space<vmem>>, vector<256x128xbf16>
    %cst_14 = arith.constant dense<0.000000e+00> : vector<16x128xf32>
    %21 = tpu.matmul %19, %20, %cst_14 {dimension_numbers = #tpu.dot_dimension_numbers<[1], [0], [0], [1], [0, 0, 1, 1], [], []>} : vector<16x256xbf16>, vector<256x128xbf16>, vector<16x128xf32> -> vector<16x128xf32>
    %c0_15 = arith.constant 0 : index
    %c0_16 = arith.constant 0 : index
    %22 = vector.load %arg7[%c0_15, %c0_16] : memref<1x128xf32, #tpu.memory_space<vmem>>, vector<1x128xf32>
    %23 = vector.broadcast %22 : vector<1x128xf32> to vector<16x128xf32>
    %24 = arith.addf %21, %23 : vector<16x128xf32>
    %c0_17 = arith.constant 0 : index
    %c0_18 = arith.constant 0 : index
    %25 = vector.load %arg8[%c0_17, %c0_18] : memref<16x128xf32, #tpu.memory_space<vmem>>, vector<16x128xf32>
    tpu.vector_store %arg8[%c0_17, %c0_18], %24 {strides = array<i32>} : memref<16x128xf32, #tpu.memory_space<vmem>>, vector<16x128xf32>,
    return
  }
  func.func @transform_0(%arg0: i32) -> (i32, i32) {
    %c0_i32 = arith.constant 0 : i32
    %c0_i32_0 = arith.constant 0 : i32
    return %arg0, %c0_i32 : i32, i32
  }
  func.func @transform_1(%arg0: i32) -> (i32, i32) {
    %c0_i32 = arith.constant 0 : i32
    %c0_i32_0 = arith.constant 0 : i32
    %c0_i32_1 = arith.constant 0 : i32
    return %c0_i32, %c0_i32_0 : i32, i32
  }
  func.func @transform_2(%arg0: i32) -> (i32, i32) {
    %c0_i32 = arith.constant 0 : i32
    %c0_i32_0 = arith.constant 0 : i32
    %c0_i32_1 = arith.constant 0 : i32
    return %c0_i32, %c0_i32_0 : i32, i32
  }
  func.func @transform_3(%arg0: i32) -> (i32, i32) {
    %c0_i32 = arith.constant 0 : i32
    %c0_i32_0 = arith.constant 0 : i32
    %c0_i32_1 = arith.constant 0 : i32
    return %c0_i32, %c0_i32_0 : i32, i32
  }
  func.func @transform_4(%arg0: i32) -> (i32, i32) {
    %c0_i32 = arith.constant 0 : i32
    %c0_i32_0 = arith.constant 0 : i32
    %c0_i32_1 = arith.constant 0 : i32
    return %c0_i32, %c0_i32_0 : i32, i32
  }
  func.func @transform_5(%arg0: i32) -> (i32, i32) {
    %c0_i32 = arith.constant 0 : i32
    %c0_i32_0 = arith.constant 0 : i32
    %c0_i32_1 = arith.constant 0 : i32
    return %c0_i32, %c0_i32_0 : i32, i32
  }
  func.func @transform_6(%arg0: i32) -> (i32, i32) {
    %c0_i32 = arith.constant 0 : i32
    %c0_i32_0 = arith.constant 0 : i32
    %c0_i32_1 = arith.constant 0 : i32
    return %c0_i32, %c0_i32_0 : i32, i32
  }
  func.func @transform_7(%arg0: i32) -> (i32, i32) {
    %c0_i32 = arith.constant 0 : i32
    %c0_i32_0 = arith.constant 0 : i32
    return %arg0, %c0_i32 : i32, i32
  }
}

module attributes {stable_mosaic.version = 11 : i64} {
  func.func @_cnn1d_kernel(%arg0: i32, %arg1: memref<16x72xbf16, #tpu.memory_space<vmem>>, %arg2: memref<72x1024xbf16, #tpu.memory_space<vmem>>, %arg3: memref<1x1024xf32, #tpu.memory_space<vmem>>, %arg4: memref<512x256xbf16, #tpu.memory_space<vmem>>, %arg5: memref<1x256xf32, #tpu.memory_space<vmem>>, %arg6: memref<256x128xbf16, #tpu.memory_space<vmem>>, %arg7: memref<1x128xf32, #tpu.memory_space<vmem>>, %arg8: memref<16x128xf32, #tpu.memory_space<vmem>>) attributes {dimension_semantics = [#tpu.dimension_semantics<parallel>], iteration_bounds = array<i64: 1>, scalar_prefetch = 0 : i64, scratch_operands = 0 : i64, tpu.core_type = #tpu.core_type<tc>, window_params = [{transform_indices = @transform_0, window_bounds = array<i64: 16, 72>}, {pipeline_mode = #tpu.pipeline_mode<synchronous>, transform_indices = @transform_1, window_bounds = array<i64: 72, 1024>}, {pipeline_mode = #tpu.pipeline_mode<synchronous>, transform_indices = @transform_2, window_bounds = array<i64: 1, 1024>}, {pipeline_mode = #tpu.pipeline_mode<synchronous>, transform_indices = @transform_3, window_bounds = array<i64: 512, 256>}, {pipeline_mode = #tpu.pipeline_mode<synchronous>, transform_indices = @transform_4, window_bounds = array<i64: 1, 256>}, {pipeline_mode = #tpu.pipeline_mode<synchronous>, transform_indices = @transform_5, window_bounds = array<i64: 256, 128>}, {pipeline_mode = #tpu.pipeline_mode<synchronous>, transform_indices = @transform_6, window_bounds = array<i64: 1, 128>}, {transform_indices = @transform_7, window_bounds = array<i64: 16, 128>}]} {
    %c0 = arith.constant 0 : index
    %c0_0 = arith.constant 0 : index
    %0 = vector.load %arg1[%c0, %c0_0] : memref<16x72xbf16, #tpu.memory_space<vmem>>, vector<16x72xbf16>
    %c0_1 = arith.constant 0 : index
    %c0_2 = arith.constant 0 : index
    %1 = vector.load %arg2[%c0_1, %c0_2] : memref<72x1024xbf16, #tpu.memory_space<vmem>>, vector<72x1024xbf16>
    %cst = arith.constant dense<0.000000e+00> : vector<16x1024xf32>
    %2 = tpu.matmul %0, %1, %cst {dimension_numbers = #tpu.dot_dimension_numbers<[1], [0], [0], [1], [0, 0, 1, 1], [], []>} : vector<16x72xbf16>, vector<72x1024xbf16>, vector<16x1024xf32> -> vector<16x1024xf32>
    %c0_3 = arith.constant 0 : index
    %c0_4 = arith.constant 0 : index
    %3 = vector.load %arg3[%c0_3, %c0_4] : memref<1x1024xf32, #tpu.memory_space<vmem>>, vector<1x1024xf32>
    %4 = vector.broadcast %3 : vector<1x1024xf32> to vector<16x1024xf32>
    %5 = arith.addf %2, %4 : vector<16x1024xf32>
    %cst_5 = arith.constant 0.000000e+00 : f32
    %6 = vector.broadcast %cst_5 : f32 to vector<16x1024xf32>
    %7 = arith.maximumf %5, %6 : vector<16x1024xf32>
    %8 = vector.extract_strided_slice %7 {offsets = [0, 0], sizes = [16, 512], strides = [1, 1]} : vector<16x1024xf32> to vector<16x512xf32>
    %9 = vector.extract_strided_slice %7 {offsets = [0, 512], sizes = [16, 512], strides = [1, 1]} : vector<16x1024xf32> to vector<16x512xf32>
    %10 = arith.maximumf %8, %9 : vector<16x512xf32>
    %11 = arith.truncf %10 : vector<16x512xf32> to vector<16x512xbf16>
    %c0_6 = arith.constant 0 : index
    %c0_7 = arith.constant 0 : index
    %12 = vector.load %arg4[%c0_6, %c0_7] : memref<512x256xbf16, #tpu.memory_space<vmem>>, vector<512x256xbf16>
    %cst_8 = arith.constant dense<0.000000e+00> : vector<16x256xf32>
    %13 = tpu.matmul %11, %12, %cst_8 {dimension_numbers = #tpu.dot_dimension_numbers<[1], [0], [0], [1], [0, 0, 1, 1], [], []>} : vector<16x512xbf16>, vector<512x256xbf16>, vector<16x256xf32> -> vector<16x256xf32>
    %c0_9 = arith.constant 0 : index
    %c0_10 = arith.constant 0 : index
    %14 = vector.load %arg5[%c0_9, %c0_10] : memref<1x256xf32, #tpu.memory_space<vmem>>, vector<1x256xf32>
    %15 = vector.broadcast %14 : vector<1x256xf32> to vector<16x256xf32>
    %16 = arith.addf %13, %15 : vector<16x256xf32>
    %cst_11 = arith.constant 0.000000e+00 : f32
    %17 = vector.broadcast %cst_11 : f32 to vector<16x256xf32>
    %18 = arith.maximumf %16, %17 : vector<16x256xf32>
    %19 = arith.truncf %18 : vector<16x256xf32> to vector<16x256xbf16>
    %c0_12 = arith.constant 0 : index
    %c0_13 = arith.constant 0 : index
    %20 = vector.load %arg6[%c0_12, %c0_13] : memref<256x128xbf16, #tpu.memory_space<vmem>>, vector<256x128xbf16>
    %cst_14 = arith.constant dense<0.000000e+00> : vector<16x128xf32>
    %21 = tpu.matmul %19, %20, %cst_14 {dimension_numbers = #tpu.dot_dimension_numbers<[1], [0], [0], [1], [0, 0, 1, 1], [], []>} : vector<16x256xbf16>, vector<256x128xbf16>, vector<16x128xf32> -> vector<16x128xf32>
    %c0_15 = arith.constant 0 : index
    %c0_16 = arith.constant 0 : index
    %22 = vector.load %arg7[%c0_15, %c0_16] : memref<1x128xf32, #tpu.memory_space<vmem>>, vector<1x128xf32>
    %23 = vector.broadcast %22 : vector<1x128xf32> to vector<16x128xf32>
    %24 = arith.addf %21, %23 : vector<16x128xf32>
    %c0_17 = arith.constant 0 : index
    %c0_18 = arith.constant 0 : index
    %25 = vector.load %arg8[%c0_17, %c0_18] : memref<16x128xf32, #tpu.memory_space<vmem>>, vector<16x128xf32>
    tpu.vector_store %arg8[%c0_17, %c0_18], %24 {strides = array<i32>} : memref<16x128xf32, #tpu.memory_space<vmem>>, vector<16x128xf32>,
    return
  }
  func.func @transform_0(%arg0: i32) -> (i32, i32) {
    %c0_i32 = arith.constant 0 : i32
    %c0_i32_0 = arith.constant 0 : i32
    return %arg0, %c0_i32 : i32, i32
  }
  func.func @transform_1(%arg0: i32) -> (i32, i32) {
    %c0_i32 = arith.constant 0 : i32
    %c0_i32_0 = arith.constant 0 : i32
    %c0_i32_1 = arith.constant 0 : i32
    return %c0_i32, %c0_i32_0 : i32, i32
  }
  func.func @transform_2(%arg0: i32) -> (i32, i32) {
    %c0_i32 = arith.constant 0 : i32
    %c0_i32_0 = arith.constant 0 : i32
    %c0_i32_1 = arith.constant 0 : i32
    return %c0_i32, %c0_i32_0 : i32, i32
  }
  func.func @transform_3(%arg0: i32) -> (i32, i32) {
    %c0_i32 = arith.constant 0 : i32
    %c0_i32_0 = arith.constant 0 : i32
    %c0_i32_1 = arith.constant 0 : i32
    return %c0_i32, %c0_i32_0 : i32, i32
  }
  func.func @transform_4(%arg0: i32) -> (i32, i32) {
    %c0_i32 = arith.constant 0 : i32
    %c0_i32_0 = arith.constant 0 : i32
    %c0_i32_1 = arith.constant 0 : i32
    return %c0_i32, %c0_i32_0 : i32, i32
  }
  func.func @transform_5(%arg0: i32) -> (i32, i32) {
    %c0_i32 = arith.constant 0 : i32
    %c0_i32_0 = arith.constant 0 : i32
    %c0_i32_1 = arith.constant 0 : i32
    return %c0_i32, %c0_i32_0 : i32, i32
  }
  func.func @transform_6(%arg0: i32) -> (i32, i32) {
    %c0_i32 = arith.constant 0 : i32
    %c0_i32_0 = arith.constant 0 : i32
    %c0_i32_1 = arith.constant 0 : i32
    return %c0_i32, %c0_i32_0 : i32, i32
  }
  func.func @transform_7(%arg0: i32) -> (i32, i32) {
    %c0_i32 = arith.constant 0 : i32
    %c0_i32_0 = arith.constant 0 : i32
    return %arg0, %c0_i32 : i32, i32
  }
}

</mosaic_0001>

<bundles_post_ra>
// kernel: tpu_custom_call.1
= control target key start
LH: loop header
LB: loop body
LE: loop exit
PB: predicated region body
PF: predicated region fallthrough
CT: control target
= control target key end

     0   :  { %12 = vsyncpa [#allocation3], 0  ;;  %s1890_s0 = inlined_call_operand.hbm [shape: bf16[16,72], index: 0, kind: input, shape index: {}]   ;;  %s1891_s1 = inlined_call_operand.hbm [shape: bf16[72,1024], index: 1, kind: input, shape index: {}]   ;;  %s1892_s2 = inlined_call_operand.hbm [shape: f32[1,1024], index: 2, kind: input, shape index: {}]   ;;  %s1893_s3 = inlined_call_operand.hbm [shape: bf16[512,256], index: 3, kind: input, shape index: {}]   ;;  %s1894_s4 = inlined_call_operand.vmem [shape: f32[1,256], index: 4, kind: input, shape index: {}]   ;;  %s1895_s5 = inlined_call_operand.hbm [shape: bf16[256,128], index: 5, kind: input, shape index: {}]   ;;  %s1896_s6 = inlined_call_operand.vmem [shape: f32[1,128], index: 6, kind: input, shape index: {}]   ;;  %s1897_s7 = inlined_call_operand.hbm [shape: f32[16,128], index: 7, kind: output, shape index: {}]  }
   0x1   :  { %13 = vsyncpa [#allocation6], 0 }
   0x2   :  { %14 = vsyncpa [#allocation9], 0 }
   0x3   :  { %15 = vsyncpa [#allocation4], 0  ;;  %s1707_s24 = smov [#allocation5]   ;;  %s1567_s28 = scalar_lea.hbm %s1891_s1, 4608 }
   0x4   :  { %s33_s25 = sshll.u32 %s1707_s24, 4  ;;  %p1568_p0 = scmp.ne.s32.totalorder %s1891_s1, %s1567_s28  ;;  %s34_s25 = int_to_ptr.vmem [resolvable:$true] %s33_s25 }
   0x5   :  { %p1571_p1 = scmp.lt.u32.totalorder %s1567_s28, %s1891_s1 }
   0x7   :  { %p1573_p2 = pnand %p1571_p1, %p1568_p0 }
   0x9   :  { %1576 = shalt.err (!%p1573_p2)
}
   0xa   :  { %s1577_s10 = scalar_lea.vmem %s34_s25, 4608  ;;  %p1582_p4 = scmp.lt.s32.totalorder %s34_s25, %s34_s25 }
   0xb   :  { %p1578_p3 = scmp.ne.s32.totalorder %s34_s25, %s1577_s10  ;;  %p1583_p5 = scmp.lt.s32.totalorder %s1577_s10, %s1577_s10 }
   0xd   :  { %p1584_p6 = por %p1583_p5, %p1582_p4 }
   0xf   :  { %p1585_p7 = pnand %p1584_p6, %p1578_p3 }
  0x11   :  { %1588 = shalt.err (!%p1585_p7)
}
  0x12   :  { %s1708_s11 = smov 512   ;;  %s1709_s12 = smov 32  }
  0x13   :  { %39 = dma.hbm_to_vmem [thread:$0]  %s1891_s1, 4608, %s34_s25, [#allocation6], %s1708_s11, %s1708_s11, %s1709_s12  }
  0x14   :  { %s1710_s15 = smov [#allocation8]   ;;  %s1589_s19 = scalar_lea.hbm %s1893_s3, 8192 }
  0x15   :  { %s55_s16 = sshll.u32 %s1710_s15, 4  ;;  %p1590_p8 = scmp.ne.s32.totalorder %s1893_s3, %s1589_s19  ;;  %s56_s16 = int_to_ptr.vmem [resolvable:$true] %s55_s16 }
  0x16   :  { %p1593_p9 = scmp.lt.u32.totalorder %s1589_s19, %s1893_s3 }
  0x18   :  { %p1595_p10 = pnand %p1593_p9, %p1590_p8 }
  0x1a   :  { %1598 = shalt.err (!%p1595_p10)
}
  0x1b   :  { %s1599_s24 = scalar_lea.vmem %s56_s16, 8192  ;;  %p1604_p12 = scmp.lt.s32.totalorder %s56_s16, %s56_s16 }
  0x1c   :  { %p1600_p11 = scmp.ne.s32.totalorder %s56_s16, %s1599_s24  ;;  %p1605_p13 = scmp.lt.s32.totalorder %s1599_s24, %s1599_s24 }
  0x1e   :  { %p1606_p0 = por %p1605_p13, %p1604_p12 }
  0x20   :  { %p1607_p1 = pnand %p1606_p0, %p1600_p11 }
  0x22   :  { %1610 = shalt.err (!%p1607_p1)
}
  0x23   :  { %s1711_s1 = smov 128   ;;  %s1712_s25 = smov 8  }
  0x24   :  { %61 = dma.hbm_to_vmem [thread:$0]  %s1893_s3, 8192, %s56_s16, [#allocation9], %s1711_s1, %s1711_s1, %s1712_s25  }
  0x25   :  { %s1713_s28 = smov [#allocation2]   ;;  %s1611_s9 = scalar_lea.hbm %s1890_s0, 128 }
  0x26   :  { %s21_s29 = sshll.u32 %s1713_s28, 4  ;;  %p1612_p2 = scmp.ne.s32.totalorder %s1890_s0, %s1611_s9  ;;  %s22_s29 = int_to_ptr.vmem [resolvable:$true] %s21_s29 }
  0x27   :  { %p1615_p3 = scmp.lt.u32.totalorder %s1611_s9, %s1890_s0 }
  0x29   :  { %p1617_p4 = pnand %p1615_p3, %p1612_p2 }
  0x2b   :  { %1620 = shalt.err (!%p1617_p4)
}
  0x2c   :  { %s1621_s14 = scalar_lea.vmem %s22_s29, 128  ;;  %p1626_p6 = scmp.lt.s32.totalorder %s22_s29, %s22_s29 }
  0x2d   :  { %p1622_p5 = scmp.ne.s32.totalorder %s22_s29, %s1621_s14  ;;  %p1627_p7 = scmp.lt.s32.totalorder %s1621_s14, %s1621_s14 }
  0x2f   :  { %p1628_p8 = por %p1627_p7, %p1626_p6 }
  0x31   :  { %p1629_p9 = pnand %p1628_p8, %p1622_p5 }
  0x33   :  { %1632 = shalt.err (!%p1629_p9)
}
  0x34   :  { %s1714_s3 = smov 64   ;;  %s1715_s15 = smov 4  }
  0x35   :  { %27 = dma.hbm_to_vmem [thread:$0]  %s1890_s0, 128, %s22_s29, [#allocation3], %s1714_s3, %s1714_s3, %s1715_s15  }
  0x36   :  { %s1716_s18 = smov [#allocation7]   ;;  %s1717_s20 = smov [#allocation10]  }
  0x37   :  { %s46_s19 = sshll.u32 %s1716_s18, 4  ;;  %s69_s21 = sshll.u32 %s1717_s20, 4  ;;  %s47_s19 = int_to_ptr.vmem [resolvable:$true] %s46_s19  ;;  %s70_s21 = int_to_ptr.vmem [resolvable:$true] %s69_s21 }
  0x38   :  { %s1633_s24 = scalar_lea.hbm %s1892_s2, 128 }
  0x39   :  { %p1634_p10 = scmp.ne.s32.totalorder %s1892_s2, %s1633_s24  ;;  %p1637_p11 = scmp.lt.u32.totalorder %s1633_s24, %s1892_s2 }
  0x3b   :  { %p1639_p12 = pnand %p1637_p11, %p1634_p10 }
  0x3d   :  { %1642 = shalt.err (!%p1639_p12)
}
  0x3e   :  { %s1643_s0 = scalar_lea.vmem %s47_s19, 128  ;;  %p1648_p0 = scmp.lt.s32.totalorder %s47_s19, %s47_s19 }
  0x3f   :  { %p1644_p13 = scmp.ne.s32.totalorder %s47_s19, %s1643_s0  ;;  %p1649_p1 = scmp.lt.s32.totalorder %s1643_s0, %s1643_s0 }
  0x41   :  { %p1650_p2 = por %p1649_p1, %p1648_p0 }
  0x43   :  { %p1651_p3 = pnand %p1650_p2, %p1644_p13 }
  0x45   :  { %1654 = shalt.err (!%p1651_p3)
}
  0x46   :  { %49 = dma.hbm_to_vmem [thread:$0]  %s1892_s2, 128, %s47_s19, [#allocation6]  }
  0x47   :  { %s1655_s11 = scalar_lea.hbm %s1895_s5, 2048 }
  0x48   :  { %p1656_p4 = scmp.ne.s32.totalorder %s1895_s5, %s1655_s11  ;;  %p1659_p5 = scmp.lt.u32.totalorder %s1655_s11, %s1895_s5 }
  0x4a   :  { %p1661_p6 = pnand %p1659_p5, %p1656_p4 }
  0x4c   :  { %1664 = shalt.err (!%p1661_p6)
}
  0x4d   :  { %s1665_s17 = scalar_lea.vmem %s70_s21, 2048  ;;  %p1670_p8 = scmp.lt.s32.totalorder %s70_s21, %s70_s21 }
  0x4e   :  { %p1666_p7 = scmp.ne.s32.totalorder %s70_s21, %s1665_s17  ;;  %p1671_p9 = scmp.lt.s32.totalorder %s1665_s17, %s1665_s17 }
  0x50   :  { %p1672_p10 = por %p1671_p9, %p1670_p8 }
  0x52   :  { %p1673_p11 = pnand %p1672_p10, %p1666_p7 }
  0x54   :  { %1676 = shalt.err (!%p1673_p11)
}
  0x55   :  { %75 = dma.hbm_to_vmem [thread:$0]  %s1895_s5, 2048, %s70_s21, [#allocation9], %s1714_s3, %s1714_s3, %s1715_s15  }
  0x56   :  { %1699 = dma.done.wait [#allocation3], 128  }
  0x57   :  { %1700 = vsyncadd [#allocation3], 4294967168 }
  0x58   :  { %1701 = dma.done.wait [#allocation6], 4736  }
  0x59   :  { %1702 = vsyncadd [#allocation6], 4294962560 }
  0x5a   :  { %1703 = dma.done.wait [#allocation9], 10240  }
  0x5b   :  { %1704 = vsyncadd [#allocation9], 4294957056  ;;  %v1718_v0 = vmov 0   ;;  %v96_v1 = vld [vmem:[#allocation5] sm:$0xff]  ;;  %v99_v11 = vld [vmem:[#allocation5 + $0x18] sm:$0xff]  ;;  %vm363_vm0 = vcmask 1043456  }
  0x5c   :  { %420 = vmatprep.mubr.bf16.mxu0 %v1718_v0  ;;  %549 = vmatprep.mubr.bf16.mxu1 %v1718_v0  ;;  %v100_v2 = vld [vmem:[#allocation5 + $0x20] sm:$0xff]  ;;  %v103_v14 = vld [vmem:[#allocation5 + $0x38] sm:$0xff]  ;;  %v97_v33 = vld [vmem:[#allocation5 + $0x8] sm:$0xff]  ;;  %vm359_vm1 = vcmask 588800   ;;  %s1719_s19 = smov [#allocation11]  }
  0x5d   :  { %v104_v3 = vld [vmem:[#allocation5 + $0x40] sm:$0xff]  ;;  %v1275_v4 = vcombine.high %v96_v1, %v100_v2  ;;  %v1274_v5 = vcombine.low %v96_v1, %v100_v2  ;;  %v1281_v16 = vcombine.high %v99_v11, %v103_v14  ;;  %v1280_v17 = vcombine.low %v99_v11, %v103_v14  ;;  %v107_v18 = vld [vmem:[#allocation5 + $0x58] sm:$0xff]  ;;  %v101_v35 = vld [vmem:[#allocation5 + $0x28] sm:$0xff]  ;;  %s1259_s20 = sshll.u32 %s1719_s19, 4  ;;  %s1260_s20 = int_to_ptr.vmem [resolvable:$true] %s1259_s20 }
  0x5e   :  { %v108_v6 = vld [vmem:[#allocation5 + $0x60] sm:$0xff]  ;;  %v111_v19 = vld [vmem:[#allocation5 + $0x78] sm:$0xff]  ;;  %v1277_v39 = vcombine.high %v97_v33, %v101_v35  ;;  %v105_v40 = vld [vmem:[#allocation5 + $0x48] sm:$0xff]  ;;  %v1276_v46 = vcombine.low %v97_v33, %v101_v35  ;;  %s1677_s21 = scalar_lea.vmem %s1260_s20, 256  ;;  %p1682_p13 = scmp.lt.s32.totalorder %s1260_s20, %s1260_s20 }
  0x5f   :  { %v1283_v7 = vcombine.high %v104_v3, %v108_v6  ;;  %v112_v8 = vld [vmem:[#allocation5 + $0x80] sm:$0xff]  ;;  %388 = vmatprep.subr.bf16.mxu0 %v1275_v4  ;;  %v1282_v10 = vcombine.low %v104_v3, %v108_v6  ;;  %v1289_v20 = vcombine.high %v107_v18, %v111_v19  ;;  %v115_v21 = vld [vmem:[#allocation5 + $0x98] sm:$0xff]  ;;  %517 = vmatprep.subr.bf16.mxu1 %v1281_v16  ;;  %v109_v42 = vld [vmem:[#allocation5 + $0x68] sm:$0xff]  ;;  %p1678_p12 = scmp.ne.s32.totalorder %s1260_s20, %s1677_s21  ;;  %p1683_p0 = scmp.lt.s32.totalorder %s1677_s21, %s1677_s21 }
  0x60   :  { %v116_v9 = vld [vmem:[#allocation5 + $0xa0] sm:$0xff]  ;;  %389 = vmatpush1.bf16.msra.mxu0 %v1274_v5  ;;  %v119_v22 = vld [vmem:[#allocation5 + $0xb8] sm:$0xff]  ;;  %518 = vmatpush1.bf16.msra.mxu1 %v1280_v17  ;;  %v1288_v25 = vcombine.low %v107_v18, %v111_v19  ;;  %v113_v47 = vld [vmem:[#allocation5 + $0x88] sm:$0xff]  ;;  %v1285_v48 = vcombine.high %v105_v40, %v109_v42  ;;  %v1284_v52 = vcombine.low %v105_v40, %v109_v42 }
  0x61   :  { %390 = vmatprep.subr.bf16.mxu0 %v1283_v7  ;;  %v1291_v12 = vcombine.high %v112_v8, %v116_v9  ;;  %v120_v13 = vld [vmem:[#allocation5 + $0xc0] sm:$0xff]  ;;  %v1290_v23 = vcombine.low %v112_v8, %v116_v9  ;;  %519 = vmatprep.subr.bf16.mxu1 %v1289_v20  ;;  %v1297_v27 = vcombine.high %v115_v21, %v119_v22  ;;  %v123_v28 = vld [vmem:[#allocation5 + $0xd8] sm:$0xff]  ;;  %v117_v49 = vld [vmem:[#allocation5 + $0xa8] sm:$0xff]  ;;  %p1684_p1 = por %p1683_p0, %p1682_p13 }
  0x62   :  { %v124_v15 = vld [vmem:[#allocation5 + $0xe0] sm:$0xff]  ;;  %v127_v29 = vld [vmem:[#allocation5 + $0xf8] sm:$0xff]  ;;  %v1296_v34 = vcombine.low %v115_v21, %v119_v22  ;;  %v1472_v51 = vld [vmem:[#allocation8 + $0x4] ss:$8 sps:$4 sm:$0xff]   ;;  %v1293_v55 = vcombine.high %v113_v47, %v117_v49  ;;  %v1292_v59 = vcombine.low %v113_v47, %v117_v49 }
  0x63   :  { %v1299_v24 = vcombine.high %v120_v13, %v124_v15  ;;  %v128_v26 = vld [vmem:[#allocation5 + $0x100] sm:$0xff]  ;;  %v1298_v30 = vcombine.low %v120_v13, %v124_v15  ;;  %v1305_v36 = vcombine.high %v123_v28, %v127_v29  ;;  %v131_v37 = vld [vmem:[#allocation5 + $0x118] sm:$0xff]  ;;  %v1304_v41 = vcombine.low %v123_v28, %v127_v29  ;;  %v121_v53 = vld [vmem:[#allocation5 + $0xc8] sm:$0xff]  ;;  %p1685_p2 = pnand %p1684_p1, %p1678_p12 }
  0x64   :  { %391 = vmatpush1.bf16.msra.mxu0 %v1282_v10  ;;  %v1307_v31 = vcombine.high %v128_v26, %v128_v26  ;;  %v1306_v32 = vcombine.low %v128_v26, %v128_v26  ;;  %520 = vmatpush1.bf16.msra.mxu1 %v1288_v25  ;;  %v1313_v43 = vcombine.high %v131_v37, %v131_v37  ;;  %v1833_v45 = vld [vmem:[#allocation2] sm:$0xff]   ;;  %v125_v54 = vld [vmem:[#allocation5 + $0xe8] sm:$0xff]  ;;  %v98_v2 = vld [vmem:[#allocation5 + $0x10] sm:$0xff] }
  0x65   :  { %392 = vmatprep.subr.bf16.mxu0 %v1291_v12  ;;  %521 = vmatprep.subr.bf16.mxu1 %v1297_v27  ;;  %v1312_v44 = vcombine.low %v131_v37, %v131_v37  ;;  %v1470_v56 = vld [vmem:[#allocation8] ss:$8 sps:$4 sm:$0xff]   ;;  %v1478_v57 = vld [vmem:[#allocation8 + $0x14] ss:$8 sps:$4 sm:$0xff]   ;;  %v1476_v58 = vld [vmem:[#allocation8 + $0x10] ss:$8 sps:$4 sm:$0xff]   ;;  %v1301_v62 = vcombine.high %v121_v53, %v125_v54  ;;  %v1300_v1 = vcombine.low %v121_v53, %v125_v54 }
  0x66   :  { %v365_v38 = vsel %vm363_vm0, %v1306_v32, 0  ;;  %v129_v60 = vld [vmem:[#allocation5 + $0x108] sm:$0xff]  ;;  %v102_v3 = vld [vmem:[#allocation5 + $0x30] sm:$0xff]  ;;  %v1460_v26 = vld [vmem:[#allocation8 + $0x114] ss:$8 sps:$4 sm:$0xff]  }
  0x67   :  { %v383_v50 = vsel %vm363_vm0, %v1312_v44, 0  ;;  %v1484_v61 = vld [vmem:[#allocation8 + $0x24] ss:$8 sps:$4 sm:$0xff]   ;;  %v1482_v63 = vld [vmem:[#allocation8 + $0x20] ss:$8 sps:$4 sm:$0xff]   ;;  %v1309_v4 = vcombine.high %v129_v60, %v129_v60  ;;  %v1308_v5 = vcombine.low %v129_v60, %v129_v60  ;;  %v1279_v9 = vcombine.high %v98_v2, %v102_v3 }
  0x68   :  { %393 = vmatpush1.bf16.msra.mxu0 %v1290_v23  ;;  %522 = vmatpush1.bf16.msra.mxu1 %v1296_v34  ;;  %v106_v6 = vld [vmem:[#allocation5 + $0x50] sm:$0xff]  ;;  %v1278_v10 = vcombine.low %v98_v2, %v102_v3  ;;  %v1458_v27 = vld [vmem:[#allocation8 + $0x110] ss:$8 sps:$4 sm:$0xff]   ;;  %v1475_v34 = vld [vmem:[#allocation8 + $0x154] ss:$8 sps:$4 sm:$0xff]  }
  0x69   :  { %394 = vmatprep.subr.bf16.mxu0 %v1299_v24  ;;  %523 = vmatprep.subr.bf16.mxu1 %v1305_v36  ;;  %v110_v7 = vld [vmem:[#allocation5 + $0x70] sm:$0xff]  ;;  %v371_v8 = vsel %vm363_vm0, %v1308_v5, 0  ;;  %v1473_v35 = vld [vmem:[#allocation8 + $0x150] ss:$8 sps:$4 sm:$0xff]   ;;  %v1490_v40 = vld [vmem:[#allocation8 + $0x34] ss:$8 sps:$4 sm:$0xff]  }
  0x6a   :  { %v114_v11 = vld [vmem:[#allocation5 + $0x90] sm:$0xff]  ;;  %v1287_v13 = vcombine.high %v106_v6, %v110_v7  ;;  %v1286_v14 = vcombine.low %v106_v6, %v110_v7  ;;  %v1488_v42 = vld [vmem:[#allocation8 + $0x30] ss:$8 sps:$4 sm:$0xff]   ;;  %v1502_v49 = vld [vmem:[#allocation8 + $0x54] ss:$8 sps:$4 sm:$0xff]  }
  0x6b   :  { %v118_v12 = vld [vmem:[#allocation5 + $0xb0] sm:$0xff]  ;;  %v1497_v47 = vld [vmem:[#allocation8 + $0x190] ss:$8 sps:$4 sm:$0xff]   ;;  %v1511_v53 = vld [vmem:[#allocation8 + $0x1b4] ss:$8 sps:$4 sm:$0xff]  }
  0x6c   :  { %395 = vmatpush1.bf16.msra.mxu0 %v1298_v30  ;;  %524 = vmatpush1.bf16.msra.mxu1 %v1304_v41  ;;  %v122_v15 = vld [vmem:[#allocation5 + $0xd0] sm:$0xff]  ;;  %v1295_v17 = vcombine.high %v114_v11, %v118_v12  ;;  %v1294_v18 = vcombine.low %v114_v11, %v118_v12  ;;  %v1466_v30 = vld [vmem:[#allocation8 + $0x134] ss:$8 sps:$4 sm:$0xff]   ;;  %v1524_v3 = vld [vmem:[#allocation8 + $0x90] ss:$8 sps:$4 sm:$0xff]  }
  0x6d   :  { %1314 = vmatprep.subr.msk.bf16.mxu0 %vm363_vm0, %v1307_v31  ;;  %1320 = vmatprep.subr.msk.bf16.mxu1 %vm363_vm0, %v1313_v43  ;;  %v126_v16 = vld [vmem:[#allocation5 + $0xf0] sm:$0xff]  ;;  %v1464_v31 = vld [vmem:[#allocation8 + $0x130] ss:$8 sps:$4 sm:$0xff]   ;;  %v1535_v6 = vld [vmem:[#allocation8 + $0x1f4] ss:$8 sps:$4 sm:$0xff]  }
  0x6e   :  { %v130_v19 = vld [vmem:[#allocation5 + $0x110] sm:$0xff]  ;;  %v1303_v20 = vcombine.high %v122_v15, %v126_v16  ;;  %v1302_v21 = vcombine.low %v122_v15, %v126_v16 }
  0x6f   :  { %v1311_v22 = vcombine.high %v130_v19, %v130_v19  ;;  %v1310_v23 = vcombine.low %v130_v19, %v130_v19  ;;  %v1457_v25 = vld [vmem:[#allocation8 + $0x104] ss:$8 sps:$4 sm:$0xff]   ;;  %v1461_v29 = vld [vmem:[#allocation8 + $0x120] ss:$8 sps:$4 sm:$0xff]  }
  0x70   :  { %397 = vmatpush1.bf16.msra.mxu0 %v365_v38  ;;  %526 = vmatpush1.bf16.msra.mxu1 %v383_v50  ;;  %v1463_v28 = vld [vmem:[#allocation8 + $0x124] ss:$8 sps:$4 sm:$0xff]   ;;  %v1467_v33 = vld [vmem:[#allocation8 + $0x140] ss:$8 sps:$4 sm:$0xff]   ;;  %v1487_v38 = vld [vmem:[#allocation8 + $0x174] ss:$8 sps:$4 sm:$0xff]  }
  0x71   :  { %431 = vmatprep.subr.bf16.mxu0 %v1277_v39  ;;  %984 = vmatprep.subr.bf16.mxu1 %v1472_v51  ;;  %v377_v24 = vsel %vm363_vm0, %v1310_v23, 0  ;;  %v1469_v32 = vld [vmem:[#allocation8 + $0x144] ss:$8 sps:$4 sm:$0xff]   ;;  %v1479_v37 = vld [vmem:[#allocation8 + $0x160] ss:$8 sps:$4 sm:$0xff]  }
  0x72   :  { %v1481_v36 = vld [vmem:[#allocation8 + $0x164] ss:$8 sps:$4 sm:$0xff]   ;;  %v1485_v39 = vld [vmem:[#allocation8 + $0x170] ss:$8 sps:$4 sm:$0xff]   ;;  %v1491_v43 = vld [vmem:[#allocation8 + $0x180] ss:$8 sps:$4 sm:$0xff]  }
  0x73   :  { %1315 = vmatmul.mubr.msk.bf16.vlgmr.msra.gmra.mrb[0].mxu0 %vm359_vm1, %v1833_v45  ;;  %1321 = vmatmul.mubr.msk.bf16.vlgmr.msra.gmra.mrb[0].mxu1 %vm359_vm1, %v1833_v45  ;;  %v1493_v41 = vld [vmem:[#allocation8 + $0x184] ss:$8 sps:$4 sm:$0xff]   ;;  %v1503_v50 = vld [vmem:[#allocation8 + $0x1a0] ss:$8 sps:$4 sm:$0xff]  }
  0x74   :  { %432 = vmatpush1.bf16.msra.mxu0 %v1276_v46  ;;  %463 = vmatprep.mubr.bf16.mxu0 %v1718_v0  ;;  %v1496_v44 = vld [vmem:[#allocation8 + $0x44] ss:$8 sps:$4 sm:$0xff]   ;;  %v1494_v46 = vld [vmem:[#allocation8 + $0x40] ss:$8 sps:$4 sm:$0xff]  }
  0x75   :  { %433 = vmatprep.subr.bf16.mxu0 %v1285_v48  ;;  %985 = vmatpush1.bf16.msra.mxu1 %v1470_v56  ;;  %v1500_v48 = vld [vmem:[#allocation8 + $0x50] ss:$8 sps:$4 sm:$0xff]   ;;  %v1505_v51 = vld [vmem:[#allocation8 + $0x1a4] ss:$8 sps:$4 sm:$0xff]   ;;  %v1506_v54 = vld [vmem:[#allocation8 + $0x60] ss:$8 sps:$4 sm:$0xff]  }
  0x76   :  { %986 = vmatprep.subr.bf16.mxu1 %v1478_v57  ;;  %v1514_v56 = vld [vmem:[#allocation8 + $0x74] ss:$8 sps:$4 sm:$0xff]   ;;  %v1517_v57 = vld [vmem:[#allocation8 + $0x1c4] ss:$8 sps:$4 sm:$0xff]   ;;  %v1530_v7 = vld [vmem:[#allocation8 + $0xa0] ss:$8 sps:$4 sm:$0xff]  }
  0x77   :  { %v1520_v60 = vld [vmem:[#allocation8 + $0x84] ss:$8 sps:$4 sm:$0xff]   ;;  %v1539_v12 = vld [vmem:[#allocation8 + $0xc0] ss:$8 sps:$4 sm:$0xff]  }
  0x78   :  { %434 = vmatpush1.bf16.msra.mxu0 %v1284_v52  ;;  %v1508_v52 = vld [vmem:[#allocation8 + $0x64] ss:$8 sps:$4 sm:$0xff]   ;;  %v1545_v16 = vld [vmem:[#allocation8 + $0xe0] ss:$8 sps:$4 sm:$0xff]  }
  0x79   :  { %435 = vmatprep.subr.bf16.mxu0 %v1293_v55  ;;  %987 = vmatpush1.bf16.msra.mxu1 %v1476_v58  ;;  %v1509_v55 = vld [vmem:[#allocation8 + $0x1b0] ss:$8 sps:$4 sm:$0xff]   ;;  %v1529_v2 = vld [vmem:[#allocation8 + $0x1e4] ss:$8 sps:$4 sm:$0xff]  }
  0x7a   :  { %988 = vmatprep.subr.bf16.mxu1 %v1484_v61  ;;  %v1512_v58 = vld [vmem:[#allocation8 + $0x70] ss:$8 sps:$4 sm:$0xff]   ;;  %v1523_v61 = vld [vmem:[#allocation8 + $0x1d4] ss:$8 sps:$4 sm:$0xff]   ;;  %v1532_v5 = vld [vmem:[#allocation8 + $0xa4] ss:$8 sps:$4 sm:$0xff]  }
  0x7b   :  { %v1541_v11 = vld [vmem:[#allocation8 + $0xc4] ss:$8 sps:$4 sm:$0xff]  }
  0x7c   :  { %436 = vmatpush1.bf16.msra.mxu0 %v1292_v59  ;;  %v1515_v59 = vld [vmem:[#allocation8 + $0x1c0] ss:$8 sps:$4 sm:$0xff]   ;;  %v1547_v15 = vld [vmem:[#allocation8 + $0xe4] ss:$8 sps:$4 sm:$0xff]  }
  0x7d   :  { %437 = vmatprep.subr.bf16.mxu0 %v1301_v62  ;;  %989 = vmatpush1.bf16.msra.mxu1 %v1482_v63  ;;  %v1518_v62 = vld [vmem:[#allocation8 + $0x80] ss:$8 sps:$4 sm:$0xff]   ;;  %v1521_v63 = vld [vmem:[#allocation8 + $0x1d0] ss:$8 sps:$4 sm:$0xff]  }
  0x7e   :  { %990 = vmatprep.subr.bf16.mxu1 %v1490_v40 }
  0x80   :  { %438 = vmatpush1.bf16.msra.mxu0 %v1300_v1  ;;  %v1526_v1 = vld [vmem:[#allocation8 + $0x94] ss:$8 sps:$4 sm:$0xff]  }
  0x81   :  { %1316 = vmatprep.subr.msk.bf16.mxu0 %vm363_vm0, %v1309_v4  ;;  %991 = vmatpush1.bf16.msra.mxu1 %v1488_v42  ;;  %v1527_v4 = vld [vmem:[#allocation8 + $0x1e0] ss:$8 sps:$4 sm:$0xff]  }
  0x82   :  { %992 = vmatprep.subr.bf16.mxu1 %v1496_v44 }
  0x84   :  { %440 = vmatpush1.bf16.msra.mxu0 %v371_v8  ;;  %v1533_v8 = vld [vmem:[#allocation8 + $0x1f0] ss:$8 sps:$4 sm:$0xff]  }
  0x85   :  { %474 = vmatprep.subr.bf16.mxu0 %v1279_v9  ;;  %993 = vmatpush1.bf16.msra.mxu1 %v1494_v46  ;;  %v1538_v9 = vld [vmem:[#allocation8 + $0xb4] ss:$8 sps:$4 sm:$0xff]  }
  0x86   :  { %994 = vmatprep.subr.bf16.mxu1 %v1502_v49 }
  0x87   :  { %1317 = vmatmul.mubr.msk.bf16.vlgmr.msra.gmra.mrb[4].mxu0 %vm359_vm1, %v1833_v45 }
  0x88   :  { %475 = vmatpush1.bf16.msra.mxu0 %v1278_v10  ;;  %506 = vmatprep.mubr.bf16.mxu0 %v1718_v0  ;;  %v1455_v0 = vld [vmem:[#allocation8 + $0x100] ss:$8 sps:$4 sm:$0xff]   ;;  %v1536_v10 = vld [vmem:[#allocation8 + $0xb0] ss:$8 sps:$4 sm:$0xff]  }
  0x89   :  { %476 = vmatprep.subr.bf16.mxu0 %v1287_v13  ;;  %995 = vmatpush1.bf16.msra.mxu1 %v1500_v48  ;;  %v1544_v13 = vld [vmem:[#allocation8 + $0xd4] ss:$8 sps:$4 sm:$0xff]  }
  0x8a   :  { %996 = vmatprep.subr.bf16.mxu1 %v1508_v52 }
  0x8c   :  { %477 = vmatpush1.bf16.msra.mxu0 %v1286_v14  ;;  %v1542_v14 = vld [vmem:[#allocation8 + $0xd0] ss:$8 sps:$4 sm:$0xff]  }
  0x8d   :  { %478 = vmatprep.subr.bf16.mxu0 %v1295_v17  ;;  %997 = vmatpush1.bf16.msra.mxu1 %v1506_v54  ;;  %v1550_v17 = vld [vmem:[#allocation8 + $0xf4] ss:$8 sps:$4 sm:$0xff]  }
  0x8e   :  { %998 = vmatprep.subr.bf16.mxu1 %v1514_v56 }
  0x90   :  { %479 = vmatpush1.bf16.msra.mxu0 %v1294_v18  ;;  %v1548_v18 = vld [vmem:[#allocation8 + $0xf0] ss:$8 sps:$4 sm:$0xff]  }
  0x91   :  { %480 = vmatprep.subr.bf16.mxu0 %v1303_v20  ;;  %999 = vmatpush1.bf16.msra.mxu1 %v1512_v58 }
  0x92   :  { %1000 = vmatprep.subr.bf16.mxu1 %v1520_v60 }
  0x94   :  { %481 = vmatpush1.bf16.msra.mxu0 %v1302_v21 }
  0x95   :  { %1318 = vmatprep.subr.msk.bf16.mxu0 %vm363_vm0, %v1311_v22  ;;  %1001 = vmatpush1.bf16.msra.mxu1 %v1518_v62  ;;  %v134_v22 = vlaneseq }
  0x96   :  { %1002 = vmatprep.subr.bf16.mxu1 %v1526_v1 }
  0x98   :  { %483 = vmatpush1.bf16.msra.mxu0 %v377_v24 }
  0x99   :  { %1027 = vmatprep.subr.bf16.mxu0 %v1457_v25  ;;  %1003 = vmatpush1.bf16.msra.mxu1 %v1524_v3 }
  0x9a   :  { %1004 = vmatprep.subr.bf16.mxu1 %v1532_v5 }
  0x9b   :  { %1319 = vmatmul.mubr.msk.bf16.vlgmr.msra.gmra.mrb[8].mxu0 %vm359_vm1, %v1833_v45  ;;  %v1499_v45 = vld [vmem:[#allocation8 + $0x194] ss:$8 sps:$4 sm:$0xff]  }
  0x9c   :  { %1028 = vmatpush1.bf16.msra.mxu0 %v1455_v0  ;;  %v1851_v0 = vshrl.u32 %v134_v22, 7 }
  0x9d   :  { %1029 = vmatprep.subr.bf16.mxu0 %v1460_v26  ;;  %1005 = vmatpush1.bf16.msra.mxu1 %v1530_v7 }
  0x9e   :  { %1006 = vmatprep.subr.bf16.mxu1 %v1538_v9  ;;  %v140_v1 = vsub.s32 1, %v1851_v0  ;;  %v156_v3 = vsub.s32 5, %v1851_v0 }
  0xa0   :  { %1030 = vmatpush1.bf16.msra.mxu0 %v1458_v27 }
  0xa1   :  { %1031 = vmatprep.subr.bf16.mxu0 %v1463_v28  ;;  %1007 = vmatpush1.bf16.msra.mxu1 %v1536_v10  ;;  %v160_v28 = vsub.s32 6, %v1851_v0 }
  0xa2   :  { %1008 = vmatprep.subr.bf16.mxu1 %v1541_v11 }
  0xa4   :  { %1032 = vmatpush1.bf16.msra.mxu0 %v1461_v29  ;;  %v164_v29 = vsub.s32 7, %v1851_v0 }
  0xa5   :  { %1033 = vmatprep.subr.bf16.mxu0 %v1466_v30  ;;  %1009 = vmatpush1.bf16.msra.mxu1 %v1539_v12  ;;  %v132_v30 = vld [vmem:[#allocation7] sm:$0xff] }
  0xa6   :  { %1010 = vmatprep.subr.bf16.mxu1 %v1544_v13  ;;  %v141_v5 = vrot.slane %v132_v30, %v140_v1  ;;  %v157_v7 = vrot.slane %v132_v30, %v156_v3 }
  0xa8   :  { %1034 = vmatpush1.bf16.msra.mxu0 %v1464_v31  ;;  %v144_v31 = vsub.s32 2, %v1851_v0 }
  0xa9   :  { %1035 = vmatprep.subr.bf16.mxu0 %v1469_v32  ;;  %1011 = vmatpush1.bf16.msra.mxu1 %v1542_v14  ;;  %v161_v32 = vrot.slane %v132_v30, %v160_v28 }
  0xaa   :  { %1012 = vmatprep.subr.bf16.mxu1 %v1547_v15 }
  0xac   :  { %1036 = vmatpush1.bf16.msra.mxu0 %v1467_v33  ;;  %v148_v33 = vsub.s32 3, %v1851_v0 }
  0xad   :  { %1037 = vmatprep.subr.bf16.mxu0 %v1475_v34  ;;  %1013 = vmatpush1.bf16.msra.mxu1 %v1545_v16  ;;  %v165_v34 = vrot.slane %v132_v30, %v164_v29 }
  0xae   :  { %1014 = vmatprep.subr.bf16.mxu1 %v1550_v17 }
  0xb0   :  { %1038 = vmatpush1.bf16.msra.mxu0 %v1473_v35  ;;  %v145_v35 = vrot.slane %v132_v30, %v144_v31 }
  0xb1   :  { %1039 = vmatprep.subr.bf16.mxu0 %v1481_v36  ;;  %1015 = vmatpush1.bf16.msra.mxu1 %v1548_v18 }
  0xb4   :  { %1040 = vmatpush1.bf16.msra.mxu0 %v1479_v37  ;;  %v149_v37 = vrot.slane %v132_v30, %v148_v33 }
  0xb5   :  { %1041 = vmatprep.subr.bf16.mxu0 %v1487_v38 }
  0xb8   :  { %1042 = vmatpush1.bf16.msra.mxu0 %v1485_v39 }
  0xb9   :  { %1043 = vmatprep.subr.bf16.mxu0 %v1493_v41 }
  0xbc   :  { %1044 = vmatpush1.bf16.msra.mxu0 %v1491_v43 }
  0xbd   :  { %1045 = vmatprep.subr.bf16.mxu0 %v1499_v45 }
  0xc0   :  { %1046 = vmatpush1.bf16.msra.mxu0 %v1497_v47 }
  0xc1   :  { %1047 = vmatprep.subr.bf16.mxu0 %v1505_v51 }
  0xc4   :  { %1048 = vmatpush1.bf16.msra.mxu0 %v1503_v50 }
  0xc5   :  { %1049 = vmatprep.subr.bf16.mxu0 %v1511_v53 }
  0xc8   :  { %1050 = vmatpush1.bf16.msra.mxu0 %v1509_v55 }
  0xc9   :  { %1051 = vmatprep.subr.bf16.mxu0 %v1517_v57 }
  0xcc   :  { %1052 = vmatpush1.bf16.msra.mxu0 %v1515_v59 }
  0xcd   :  { %1053 = vmatprep.subr.bf16.mxu0 %v1523_v61 }
  0xd0   :  { %1054 = vmatpush1.bf16.msra.mxu0 %v1521_v63  ;;  %v136_v63 = vsub.s32 0, %v1851_v0 }
  0xd1   :  { %1055 = vmatprep.subr.bf16.mxu0 %v1529_v2  ;;  %v152_v2 = vsub.s32 4, %v1851_v0 }
  0xd4   :  { %1056 = vmatpush1.bf16.msra.mxu0 %v1527_v4  ;;  %v137_v4 = vrot.slane %v132_v30, %v136_v63 }
  0xd5   :  { %1057 = vmatprep.subr.bf16.mxu0 %v1535_v6  ;;  %v153_v6 = vrot.slane %v132_v30, %v152_v2 }
  0xd8   :  { %1058 = vmatpush1.bf16.msra.mxu0 %v1533_v8 }
 0x146   :  { %v422_v19 = vpop.f32.mrb[0].mxu0  ;;  %v551_v24 = vpop.f32.mrb[0].mxu1 }
 0x147   :  { %v424_v20 = vpop.f32.mrb[1].mxu0  ;;  %v553_v25 = vpop.f32.mrb[1].mxu1  ;;  %v552_v36 = vadd.f32 %v551_v24, %v161_v32  ;;  %v423_v8 = vadd.f32 %v422_v19, %v137_v4 }
 0x148   :  { %v426_v21 = vpop.f32.mrb[2].mxu0  ;;  %v555_v26 = vpop.f32.mrb[2].mxu1  ;;  %v554_v38 = vadd.f32 %v553_v25, %v165_v34  ;;  %v425_v9 = vadd.f32 %v424_v20, %v141_v5 }
 0x149   :  { %v428_v23 = vpop.f32.mrb[3].mxu0  ;;  %v557_v27 = vpop.f32.mrb[3].mxu1  ;;  %v556_v39 = vadd.f32 %v555_v26, %v161_v32  ;;  %v566_v43 = vmax.f32 %v552_v36, 0.0  ;;  %v427_v11 = vadd.f32 %v426_v21, %v137_v4  ;;  %v560_v17 = vmax.f32 %v423_v8, 0.0  ;;  %v1553_v36 = vld [vmem:[#allocation10 + $0x48] sm:$0xff]  }
 0x14a   :  { %v558_v41 = vadd.f32 %v557_v27, %v165_v34  ;;  %v567_v46 = vmax.f32 %v554_v38, 0.0  ;;  %v429_v14 = vadd.f32 %v428_v23, %v141_v5  ;;  %v561_v25 = vmax.f32 %v425_v9, 0.0  ;;  %v1551_v23 = vld [vmem:[#allocation10 + $0x40] sm:$0xff]   ;;  %v1555_v38 = vld [vmem:[#allocation10 + $0x50] sm:$0xff]  }
 0x14b   :  { %v574_v50 = vmax.f32 %v556_v39, 0.0  ;;  %v568_v28 = vmax.f32 %v427_v11, 0.0  ;;  %1403 = vmatprep.subr.bf16.mxu1 %v1551_v23  ;;  %v1556_v39 = vld [vmem:[#allocation10 + $0x10] sm:$0xff]  }
 0x14c   :  { %v575_v54 = vmax.f32 %v558_v41, 0.0  ;;  %v569_v30 = vmax.f32 %v429_v14, 0.0  ;;  %v1558_v41 = vld [vmem:[#allocation10 + $0x18] sm:$0xff]  }
 0x15a   :  { %v465_v40 = vpop.f32.mrb[4].mxu0 }
 0x15b   :  { %v466_v42 = vadd.f32 %v465_v40, %v145_v35  ;;  %v467_v44 = vpop.f32.mrb[5].mxu0  ;;  %v1557_v40 = vld [vmem:[#allocation10 + $0x58] sm:$0xff]  }
 0x15c   :  { %v468_v45 = vadd.f32 %v467_v44, %v149_v37  ;;  %v469_v47 = vpop.f32.mrb[6].mxu0  ;;  %v1561_v44 = vld [vmem:[#allocation10 + $0x68] sm:$0xff]  }
 0x15d   :  { %v562_v48 = vmax.f32 %v466_v42, 0.0  ;;  %v470_v49 = vadd.f32 %v469_v47, %v145_v35  ;;  %v471_v51 = vpop.f32.mrb[7].mxu0  ;;  %v1552_v35 = vld [vmem:[#allocation10] sm:$0xff]   ;;  %v1564_v47 = vld [vmem:[#allocation10 + $0x30] sm:$0xff]  }
 0x15e   :  { %v563_v52 = vmax.f32 %v468_v45, 0.0  ;;  %v472_v53 = vadd.f32 %v471_v51, %v149_v37  ;;  %v1554_v37 = vld [vmem:[#allocation10 + $0x8] sm:$0xff]   ;;  %v1559_v42 = vld [vmem:[#allocation10 + $0x60] sm:$0xff]  }
 0x15f   :  { %v578_v55 = vmax.f32 %v562_v48, %v566_v43  ;;  %v570_v56 = vmax.f32 %v470_v49, 0.0  ;;  %v1560_v43 = vld [vmem:[#allocation10 + $0x20] sm:$0xff]   ;;  %v1562_v45 = vld [vmem:[#allocation10 + $0x28] sm:$0xff]   ;;  %v1565_v48 = vld [vmem:[#allocation10 + $0x78] sm:$0xff]  }
 0x160   :  { %v579_v57 = vmax.f32 %v563_v52, %v567_v46  ;;  %v571_v58 = vmax.f32 %v472_v53, 0.0  ;;  %v1563_v46 = vld [vmem:[#allocation10 + $0x70] sm:$0xff]   ;;  %v1566_v49 = vld [vmem:[#allocation10 + $0x38] sm:$0xff]  }
 0x161   :  { %v582_v59 = vmax.f32 %v570_v56, %v574_v50 }
 0x162   :  { %v583_v60 = vmax.f32 %v571_v58, %v575_v54  ;;  %v652_v54 = vld [vmem:[%s1894_s4] sm:$0x3] }
 0x163   :  { %v586_v61 = vpack.c.bf16 %v582_v59, %v578_v55  ;;  %v657_v55 = vrot.slane %v652_v54, %v136_v63  ;;  %v661_v56 = vrot.slane %v652_v54, %v140_v1  ;;  %v1386_v1 = vld [vmem:[%s1896_s6] ss:$0 sm:$0xff] }
 0x164   :  { %v587_v62 = vpack.c.bf16 %v583_v60, %v579_v57 }
 0x166   :  { %1059 = vmatprep.mubr.bf16.mxu0 %v587_v62 }
 0x167   :  { %1060 = vmatmul.mubr.bf16.vlgmr.msra.gmra.mrb[12].mxu0 %v586_v61 }
 0x16e   :  { %v508_v10 = vpop.f32.mrb[8].mxu0 }
 0x16f   :  { %v509_v12 = vadd.f32 %v508_v10, %v153_v6  ;;  %v510_v13 = vpop.f32.mrb[9].mxu0 }
 0x170   :  { %v511_v15 = vadd.f32 %v510_v13, %v157_v7  ;;  %v512_v16 = vpop.f32.mrb[10].mxu0 }
 0x171   :  { %v564_v18 = vmax.f32 %v509_v12, 0.0  ;;  %v513_v22 = vadd.f32 %v512_v16, %v153_v6  ;;  %v514_v24 = vpop.f32.mrb[11].mxu0 }
 0x172   :  { %v565_v26 = vmax.f32 %v511_v15, 0.0  ;;  %v515_v27 = vadd.f32 %v514_v24, %v157_v7 }
 0x173   :  { %v576_v29 = vmax.f32 %v560_v17, %v564_v18  ;;  %v572_v31 = vmax.f32 %v513_v22, 0.0 }
 0x174   :  { %v577_v19 = vmax.f32 %v561_v25, %v565_v26  ;;  %v573_v20 = vmax.f32 %v515_v27, 0.0 }
 0x175   :  { %v580_v32 = vmax.f32 %v568_v28, %v572_v31 }
 0x176   :  { %v581_v21 = vmax.f32 %v569_v30, %v573_v20 }
 0x177   :  { %v584_v33 = vpack.c.bf16 %v580_v32, %v576_v29 }
 0x178   :  { %v585_v34 = vpack.c.bf16 %v581_v21, %v577_v19 }
 0x17a   :  { %1016 = vmatprep.mubr.bf16.mxu1 %v585_v34 }
 0x17b   :  { %1017 = vmatmul.mubr.bf16.vlgmr.msra.gmra.mrb[4].mxu1 %v584_v33 }
 0x17c   :  { %1404 = vmatpush3.bf16.msra.mxu1 %v1552_v35 }
 0x17d   :  { %1405 = vmatprep.subr.bf16.mxu1 %v1553_v36 }
 0x180   :  { %1406 = vmatpush3.bf16.msra.mxu1 %v1554_v37 }
 0x181   :  { %1407 = vmatprep.subr.bf16.mxu1 %v1555_v38 }
 0x184   :  { %1408 = vmatpush3.bf16.msra.mxu1 %v1556_v39 }
 0x185   :  { %1409 = vmatprep.subr.bf16.mxu1 %v1557_v40 }
 0x188   :  { %1410 = vmatpush3.bf16.msra.mxu1 %v1558_v41 }
 0x189   :  { %1411 = vmatprep.subr.bf16.mxu1 %v1559_v42 }
 0x18c   :  { %1412 = vmatpush3.bf16.msra.mxu1 %v1560_v43 }
 0x18d   :  { %1413 = vmatprep.subr.bf16.mxu1 %v1561_v44 }
 0x190   :  { %1414 = vmatpush3.bf16.msra.mxu1 %v1562_v45 }
 0x191   :  { %1415 = vmatprep.subr.bf16.mxu1 %v1563_v46 }
 0x194   :  { %1416 = vmatpush3.bf16.msra.mxu1 %v1564_v47 }
 0x195   :  { %1417 = vmatprep.subr.bf16.mxu1 %v1565_v48 }
 0x198   :  { %1418 = vmatpush3.bf16.msra.mxu1 %v1566_v49 }
 0x23a   :  { %v1061_v50 = vpop.f32.mrb[12].mxu0 }
 0x23b   :  { %v1063_v51 = vpop.f32.mrb[13].mxu0 }
 0x23c   :  { %v1065_v52 = vpop.f32.mrb[14].mxu0 }
 0x23d   :  { %v1067_v53 = vpop.f32.mrb[15].mxu0 }
 0x24e   :  { %v1018_v57 = vpop.f32.mrb[4].mxu1 }
 0x24f   :  { %v1019_v58 = vadd.f32 %v1018_v57, %v657_v55  ;;  %v1020_v59 = vpop.f32.mrb[5].mxu1 }
 0x250   :  { %v1021_v60 = vadd.f32 %v1020_v59, %v661_v56  ;;  %v1022_v61 = vpop.f32.mrb[6].mxu1 }
 0x251   :  { %v1062_v62 = vadd.f32 %v1061_v50, %v1019_v58  ;;  %v1023_v2 = vadd.f32 %v1022_v61, %v657_v55  ;;  %v1024_v3 = vpop.f32.mrb[7].mxu1 }
 0x252   :  { %v1064_v4 = vadd.f32 %v1063_v51, %v1021_v60  ;;  %v1025_v5 = vadd.f32 %v1024_v3, %v661_v56 }
 0x253   :  { %v1066_v6 = vadd.f32 %v1065_v52, %v1023_v2  ;;  %v1070_v8 = vmax.f32 %v1062_v62, 0.0 }
 0x254   :  { %v1068_v7 = vadd.f32 %v1067_v53, %v1025_v5  ;;  %v1071_v10 = vmax.f32 %v1064_v4, 0.0 }
 0x255   :  { %v1072_v9 = vmax.f32 %v1066_v6, 0.0 }
 0x256   :  { %v1073_v11 = vmax.f32 %v1068_v7, 0.0 }
 0x257   :  { %v1074_v63 = vpack.c.bf16 %v1072_v9, %v1070_v8 }
 0x258   :  { %v1075_v12 = vpack.c.bf16 %v1073_v11, %v1071_v10 }
 0x25a   :  { %1243 = vmatprep.mubr.bf16.mxu1 %v1075_v12 }
 0x25b   :  { %1244 = vmatmul.mubr.bf16.vlgmr.msra.gmra.mrb[8].mxu1 %v1074_v63 }
 0x32e   :  { %v1419_v0 = vpop.f32.mrb[8].mxu1 }
 0x32f   :  { %v1420_v13 = vpop.f32.mrb[9].mxu1 }
 0x330   :  { %v1421_v14 = vadd.f32 %v1420_v13, %v1419_v0  ;;  %v1422_v15 = vpop.f32.mrb[10].mxu1 }
 0x331   :  { %v1423_v16 = vpop.f32.mrb[11].mxu1 }
 0x332   :  { %v1246_v17 = vadd.f32 %v1421_v14, %v1386_v1  ;;  %v1424_v18 = vadd.f32 %v1423_v16, %v1422_v15 }
 0x334   :  { %1252 = vst [vmem:[#allocation11] sm:$0xff] %v1246_v17  ;;  %v1249_v22 = vadd.f32 %v1424_v18, %v1386_v1 }
 0x336   :  { %1253 = vst [vmem:[#allocation11 + $0x8] sm:$0xff] %v1249_v22 }
 0x337   :  { %1688 = shalt.err (!%p1685_p2)
}
 0x338   :  { %s1689_s23 = scalar_lea.hbm %s1897_s7, 256 }
 0x339   :  { %p1690_p3 = scmp.ne.s32.totalorder %s1897_s7, %s1689_s23  ;;  %p1693_p4 = scmp.lt.u32.totalorder %s1689_s23, %s1897_s7 }
 0x33b   :  { %p1695_p5 = pnand %p1693_p4, %p1690_p3 }
 0x33d   :  { %1698 = shalt.err (!%p1695_p5)
}
 0x33e   :  { %1265 = dma.vmem_to_hbm [thread:$0]  %s1260_s20, 256, %s1897_s7, [#allocation4], %s1711_s1, %s1711_s1, %s1712_s25  }
 0x33f   :  { %1705 = dma.done.wait [#allocation4], 256  }
 0x340   :  { %1706 = vsyncadd [#allocation4], 4294967040 }
 0x341   :  { %1269 = vsyncpa [#allocation3], 1 }
 0x342   :  { %1270 = vsyncpa [#allocation6], 1 }
 0x343   :  { %1271 = vsyncpa [#allocation9], 1 }
 0x344   :  { %1272 = vsyncpa [#allocation4], 1 }

// kernel: tpu_custom_call.1
= control target key start
LH: loop header
LB: loop body
LE: loop exit
PB: predicated region body
PF: predicated region fallthrough
CT: control target
= control target key end

     0   :  { %12 = vsyncpa [#allocation3], 0  ;;  %s1890_s0 = inlined_call_operand.hbm [shape: bf16[16,72], index: 0, kind: input, shape index: {}]   ;;  %s1891_s1 = inlined_call_operand.hbm [shape: bf16[72,1024], index: 1, kind: input, shape index: {}]   ;;  %s1892_s2 = inlined_call_operand.hbm [shape: f32[1,1024], index: 2, kind: input, shape index: {}]   ;;  %s1893_s3 = inlined_call_operand.hbm [shape: bf16[512,256], index: 3, kind: input, shape index: {}]   ;;  %s1894_s4 = inlined_call_operand.vmem [shape: f32[1,256], index: 4, kind: input, shape index: {}]   ;;  %s1895_s5 = inlined_call_operand.hbm [shape: bf16[256,128], index: 5, kind: input, shape index: {}]   ;;  %s1896_s6 = inlined_call_operand.vmem [shape: f32[1,128], index: 6, kind: input, shape index: {}]   ;;  %s1897_s7 = inlined_call_operand.hbm [shape: f32[16,128], index: 7, kind: output, shape index: {}]  }
   0x1   :  { %13 = vsyncpa [#allocation6], 0 }
   0x2   :  { %14 = vsyncpa [#allocation9], 0 }
   0x3   :  { %15 = vsyncpa [#allocation4], 0  ;;  %s1707_s24 = smov [#allocation5]   ;;  %s1567_s28 = scalar_lea.hbm %s1891_s1, 4608 }
   0x4   :  { %s33_s25 = sshll.u32 %s1707_s24, 4  ;;  %p1568_p0 = scmp.ne.s32.totalorder %s1891_s1, %s1567_s28  ;;  %s34_s25 = int_to_ptr.vmem [resolvable:$true] %s33_s25 }
   0x5   :  { %p1571_p1 = scmp.lt.u32.totalorder %s1567_s28, %s1891_s1 }
   0x7   :  { %p1573_p2 = pnand %p1571_p1, %p1568_p0 }
   0x9   :  { %1576 = shalt.err (!%p1573_p2)
}
   0xa   :  { %s1577_s10 = scalar_lea.vmem %s34_s25, 4608  ;;  %p1582_p4 = scmp.lt.s32.totalorder %s34_s25, %s34_s25 }
   0xb   :  { %p1578_p3 = scmp.ne.s32.totalorder %s34_s25, %s1577_s10  ;;  %p1583_p5 = scmp.lt.s32.totalorder %s1577_s10, %s1577_s10 }
   0xd   :  { %p1584_p6 = por %p1583_p5, %p1582_p4 }
   0xf   :  { %p1585_p7 = pnand %p1584_p6, %p1578_p3 }
  0x11   :  { %1588 = shalt.err (!%p1585_p7)
}
  0x12   :  { %s1708_s11 = smov 512   ;;  %s1709_s12 = smov 32  }
  0x13   :  { %39 = dma.hbm_to_vmem [thread:$0]  %s1891_s1, 4608, %s34_s25, [#allocation6], %s1708_s11, %s1708_s11, %s1709_s12  }
  0x14   :  { %s1710_s15 = smov [#allocation8]   ;;  %s1589_s19 = scalar_lea.hbm %s1893_s3, 8192 }
  0x15   :  { %s55_s16 = sshll.u32 %s1710_s15, 4  ;;  %p1590_p8 = scmp.ne.s32.totalorder %s1893_s3, %s1589_s19  ;;  %s56_s16 = int_to_ptr.vmem [resolvable:$true] %s55_s16 }
  0x16   :  { %p1593_p9 = scmp.lt.u32.totalorder %s1589_s19, %s1893_s3 }
  0x18   :  { %p1595_p10 = pnand %p1593_p9, %p1590_p8 }
  0x1a   :  { %1598 = shalt.err (!%p1595_p10)
}
  0x1b   :  { %s1599_s24 = scalar_lea.vmem %s56_s16, 8192  ;;  %p1604_p12 = scmp.lt.s32.totalorder %s56_s16, %s56_s16 }
  0x1c   :  { %p1600_p11 = scmp.ne.s32.totalorder %s56_s16, %s1599_s24  ;;  %p1605_p13 = scmp.lt.s32.totalorder %s1599_s24, %s1599_s24 }
  0x1e   :  { %p1606_p0 = por %p1605_p13, %p1604_p12 }
  0x20   :  { %p1607_p1 = pnand %p1606_p0, %p1600_p11 }
  0x22   :  { %1610 = shalt.err (!%p1607_p1)
}
  0x23   :  { %s1711_s1 = smov 128   ;;  %s1712_s25 = smov 8  }
  0x24   :  { %61 = dma.hbm_to_vmem [thread:$0]  %s1893_s3, 8192, %s56_s16, [#allocation9], %s1711_s1, %s1711_s1, %s1712_s25  }
  0x25   :  { %s1713_s28 = smov [#allocation2]   ;;  %s1611_s9 = scalar_lea.hbm %s1890_s0, 128 }
  0x26   :  { %s21_s29 = sshll.u32 %s1713_s28, 4  ;;  %p1612_p2 = scmp.ne.s32.totalorder %s1890_s0, %s1611_s9  ;;  %s22_s29 = int_to_ptr.vmem [resolvable:$true] %s21_s29 }
  0x27   :  { %p1615_p3 = scmp.lt.u32.totalorder %s1611_s9, %s1890_s0 }
  0x29   :  { %p1617_p4 = pnand %p1615_p3, %p1612_p2 }
  0x2b   :  { %1620 = shalt.err (!%p1617_p4)
}
  0x2c   :  { %s1621_s14 = scalar_lea.vmem %s22_s29, 128  ;;  %p1626_p6 = scmp.lt.s32.totalorder %s22_s29, %s22_s29 }
  0x2d   :  { %p1622_p5 = scmp.ne.s32.totalorder %s22_s29, %s1621_s14  ;;  %p1627_p7 = scmp.lt.s32.totalorder %s1621_s14, %s1621_s14 }
  0x2f   :  { %p1628_p8 = por %p1627_p7, %p1626_p6 }
  0x31   :  { %p1629_p9 = pnand %p1628_p8, %p1622_p5 }
  0x33   :  { %1632 = shalt.err (!%p1629_p9)
}
  0x34   :  { %s1714_s3 = smov 64   ;;  %s1715_s15 = smov 4  }
  0x35   :  { %27 = dma.hbm_to_vmem [thread:$0]  %s1890_s0, 128, %s22_s29, [#allocation3], %s1714_s3, %s1714_s3, %s1715_s15  }
  0x36   :  { %s1716_s18 = smov [#allocation7]   ;;  %s1717_s20 = smov [#allocation10]  }
  0x37   :  { %s46_s19 = sshll.u32 %s1716_s18, 4  ;;  %s69_s21 = sshll.u32 %s1717_s20, 4  ;;  %s47_s19 = int_to_ptr.vmem [resolvable:$true] %s46_s19  ;;  %s70_s21 = int_to_ptr.vmem [resolvable:$true] %s69_s21 }
  0x38   :  { %s1633_s24 = scalar_lea.hbm %s1892_s2, 128 }
  0x39   :  { %p1634_p10 = scmp.ne.s32.totalorder %s1892_s2, %s1633_s24  ;;  %p1637_p11 = scmp.lt.u32.totalorder %s1633_s24, %s1892_s2 }
  0x3b   :  { %p1639_p12 = pnand %p1637_p11, %p1634_p10 }
  0x3d   :  { %1642 = shalt.err (!%p1639_p12)
}
  0x3e   :  { %s1643_s0 = scalar_lea.vmem %s47_s19, 128  ;;  %p1648_p0 = scmp.lt.s32.totalorder %s47_s19, %s47_s19 }
  0x3f   :  { %p1644_p13 = scmp.ne.s32.totalorder %s47_s19, %s1643_s0  ;;  %p1649_p1 = scmp.lt.s32.totalorder %s1643_s0, %s1643_s0 }
  0x41   :  { %p1650_p2 = por %p1649_p1, %p1648_p0 }
  0x43   :  { %p1651_p3 = pnand %p1650_p2, %p1644_p13 }
  0x45   :  { %1654 = shalt.err (!%p1651_p3)
}
  0x46   :  { %49 = dma.hbm_to_vmem [thread:$0]  %s1892_s2, 128, %s47_s19, [#allocation6]  }
  0x47   :  { %s1655_s11 = scalar_lea.hbm %s1895_s5, 2048 }
  0x48   :  { %p1656_p4 = scmp.ne.s32.totalorder %s1895_s5, %s1655_s11  ;;  %p1659_p5 = scmp.lt.u32.totalorder %s1655_s11, %s1895_s5 }
  0x4a   :  { %p1661_p6 = pnand %p1659_p5, %p1656_p4 }
  0x4c   :  { %1664 = shalt.err (!%p1661_p6)
}
  0x4d   :  { %s1665_s17 = scalar_lea.vmem %s70_s21, 2048  ;;  %p1670_p8 = scmp.lt.s32.totalorder %s70_s21, %s70_s21 }
  0x4e   :  { %p1666_p7 = scmp.ne.s32.totalorder %s70_s21, %s1665_s17  ;;  %p1671_p9 = scmp.lt.s32.totalorder %s1665_s17, %s1665_s17 }
  0x50   :  { %p1672_p10 = por %p1671_p9, %p1670_p8 }
  0x52   :  { %p1673_p11 = pnand %p1672_p10, %p1666_p7 }
  0x54   :  { %1676 = shalt.err (!%p1673_p11)
}
  0x55   :  { %75 = dma.hbm_to_vmem [thread:$0]  %s1895_s5, 2048, %s70_s21, [#allocation9], %s1714_s3, %s1714_s3, %s1715_s15  }
  0x56   :  { %1699 = dma.done.wait [#allocation3], 128  }
  0x57   :  { %1700 = vsyncadd [#allocation3], 4294967168 }
  0x58   :  { %1701 = dma.done.wait [#allocation6], 4736  }
  0x59   :  { %1702 = vsyncadd [#allocation6], 4294962560 }
  0x5a   :  { %1703 = dma.done.wait [#allocation9], 10240  }
  0x5b   :  { %1704 = vsyncadd [#allocation9], 4294957056  ;;  %v1718_v0 = vmov 0   ;;  %v96_v1 = vld [vmem:[#allocation5] sm:$0xff]  ;;  %v99_v11 = vld [vmem:[#allocation5 + $0x18] sm:$0xff]  ;;  %vm363_vm0 = vcmask 1043456  }
  0x5c   :  { %420 = vmatprep.mubr.bf16.mxu0 %v1718_v0  ;;  %549 = vmatprep.mubr.bf16.mxu1 %v1718_v0  ;;  %v100_v2 = vld [vmem:[#allocation5 + $0x20] sm:$0xff]  ;;  %v103_v14 = vld [vmem:[#allocation5 + $0x38] sm:$0xff]  ;;  %v97_v33 = vld [vmem:[#allocation5 + $0x8] sm:$0xff]  ;;  %vm359_vm1 = vcmask 588800   ;;  %s1719_s19 = smov [#allocation11]  }
  0x5d   :  { %v104_v3 = vld [vmem:[#allocation5 + $0x40] sm:$0xff]  ;;  %v1275_v4 = vcombine.high %v96_v1, %v100_v2  ;;  %v1274_v5 = vcombine.low %v96_v1, %v100_v2  ;;  %v1281_v16 = vcombine.high %v99_v11, %v103_v14  ;;  %v1280_v17 = vcombine.low %v99_v11, %v103_v14  ;;  %v107_v18 = vld [vmem:[#allocation5 + $0x58] sm:$0xff]  ;;  %v101_v35 = vld [vmem:[#allocation5 + $0x28] sm:$0xff]  ;;  %s1259_s20 = sshll.u32 %s1719_s19, 4  ;;  %s1260_s20 = int_to_ptr.vmem [resolvable:$true] %s1259_s20 }
  0x5e   :  { %v108_v6 = vld [vmem:[#allocation5 + $0x60] sm:$0xff]  ;;  %v111_v19 = vld [vmem:[#allocation5 + $0x78] sm:$0xff]  ;;  %v1277_v39 = vcombine.high %v97_v33, %v101_v35  ;;  %v105_v40 = vld [vmem:[#allocation5 + $0x48] sm:$0xff]  ;;  %v1276_v46 = vcombine.low %v97_v33, %v101_v35  ;;  %s1677_s21 = scalar_lea.vmem %s1260_s20, 256  ;;  %p1682_p13 = scmp.lt.s32.totalorder %s1260_s20, %s1260_s20 }
  0x5f   :  { %v1283_v7 = vcombine.high %v104_v3, %v108_v6  ;;  %v112_v8 = vld [vmem:[#allocation5 + $0x80] sm:$0xff]  ;;  %388 = vmatprep.subr.bf16.mxu0 %v1275_v4  ;;  %v1282_v10 = vcombine.low %v104_v3, %v108_v6  ;;  %v1289_v20 = vcombine.high %v107_v18, %v111_v19  ;;  %v115_v21 = vld [vmem:[#allocation5 + $0x98] sm:$0xff]  ;;  %517 = vmatprep.subr.bf16.mxu1 %v1281_v16  ;;  %v109_v42 = vld [vmem:[#allocation5 + $0x68] sm:$0xff]  ;;  %p1678_p12 = scmp.ne.s32.totalorder %s1260_s20, %s1677_s21  ;;  %p1683_p0 = scmp.lt.s32.totalorder %s1677_s21, %s1677_s21 }
  0x60   :  { %v116_v9 = vld [vmem:[#allocation5 + $0xa0] sm:$0xff]  ;;  %389 = vmatpush1.bf16.msra.mxu0 %v1274_v5  ;;  %v119_v22 = vld [vmem:[#allocation5 + $0xb8] sm:$0xff]  ;;  %518 = vmatpush1.bf16.msra.mxu1 %v1280_v17  ;;  %v1288_v25 = vcombine.low %v107_v18, %v111_v19  ;;  %v113_v47 = vld [vmem:[#allocation5 + $0x88] sm:$0xff]  ;;  %v1285_v48 = vcombine.high %v105_v40, %v109_v42  ;;  %v1284_v52 = vcombine.low %v105_v40, %v109_v42 }
  0x61   :  { %390 = vmatprep.subr.bf16.mxu0 %v1283_v7  ;;  %v1291_v12 = vcombine.high %v112_v8, %v116_v9  ;;  %v120_v13 = vld [vmem:[#allocation5 + $0xc0] sm:$0xff]  ;;  %v1290_v23 = vcombine.low %v112_v8, %v116_v9  ;;  %519 = vmatprep.subr.bf16.mxu1 %v1289_v20  ;;  %v1297_v27 = vcombine.high %v115_v21, %v119_v22  ;;  %v123_v28 = vld [vmem:[#allocation5 + $0xd8] sm:$0xff]  ;;  %v117_v49 = vld [vmem:[#allocation5 + $0xa8] sm:$0xff]  ;;  %p1684_p1 = por %p1683_p0, %p1682_p13 }
  0x62   :  { %v124_v15 = vld [vmem:[#allocation5 + $0xe0] sm:$0xff]  ;;  %v127_v29 = vld [vmem:[#allocation5 + $0xf8] sm:$0xff]  ;;  %v1296_v34 = vcombine.low %v115_v21, %v119_v22  ;;  %v1472_v51 = vld [vmem:[#allocation8 + $0x4] ss:$8 sps:$4 sm:$0xff]   ;;  %v1293_v55 = vcombine.high %v113_v47, %v117_v49  ;;  %v1292_v59 = vcombine.low %v113_v47, %v117_v49 }
  0x63   :  { %v1299_v24 = vcombine.high %v120_v13, %v124_v15  ;;  %v128_v26 = vld [vmem:[#allocation5 + $0x100] sm:$0xff]  ;;  %v1298_v30 = vcombine.low %v120_v13, %v124_v15  ;;  %v1305_v36 = vcombine.high %v123_v28, %v127_v29  ;;  %v131_v37 = vld [vmem:[#allocation5 + $0x118] sm:$0xff]  ;;  %v1304_v41 = vcombine.low %v123_v28, %v127_v29  ;;  %v121_v53 = vld [vmem:[#allocation5 + $0xc8] sm:$0xff]  ;;  %p1685_p2 = pnand %p1684_p1, %p1678_p12 }
  0x64   :  { %391 = vmatpush1.bf16.msra.mxu0 %v1282_v10  ;;  %v1307_v31 = vcombine.high %v128_v26, %v128_v26  ;;  %v1306_v32 = vcombine.low %v128_v26, %v128_v26  ;;  %520 = vmatpush1.bf16.msra.mxu1 %v1288_v25  ;;  %v1313_v43 = vcombine.high %v131_v37, %v131_v37  ;;  %v1833_v45 = vld [vmem:[#allocation2] sm:$0xff]   ;;  %v125_v54 = vld [vmem:[#allocation5 + $0xe8] sm:$0xff]  ;;  %v98_v2 = vld [vmem:[#allocation5 + $0x10] sm:$0xff] }
  0x65   :  { %392 = vmatprep.subr.bf16.mxu0 %v1291_v12  ;;  %521 = vmatprep.subr.bf16.mxu1 %v1297_v27  ;;  %v1312_v44 = vcombine.low %v131_v37, %v131_v37  ;;  %v1470_v56 = vld [vmem:[#allocation8] ss:$8 sps:$4 sm:$0xff]   ;;  %v1478_v57 = vld [vmem:[#allocation8 + $0x14] ss:$8 sps:$4 sm:$0xff]   ;;  %v1476_v58 = vld [vmem:[#allocation8 + $0x10] ss:$8 sps:$4 sm:$0xff]   ;;  %v1301_v62 = vcombine.high %v121_v53, %v125_v54  ;;  %v1300_v1 = vcombine.low %v121_v53, %v125_v54 }
  0x66   :  { %v365_v38 = vsel %vm363_vm0, %v1306_v32, 0  ;;  %v129_v60 = vld [vmem:[#allocation5 + $0x108] sm:$0xff]  ;;  %v102_v3 = vld [vmem:[#allocation5 + $0x30] sm:$0xff]  ;;  %v1460_v26 = vld [vmem:[#allocation8 + $0x114] ss:$8 sps:$4 sm:$0xff]  }
  0x67   :  { %v383_v50 = vsel %vm363_vm0, %v1312_v44, 0  ;;  %v1484_v61 = vld [vmem:[#allocation8 + $0x24] ss:$8 sps:$4 sm:$0xff]   ;;  %v1482_v63 = vld [vmem:[#allocation8 + $0x20] ss:$8 sps:$4 sm:$0xff]   ;;  %v1309_v4 = vcombine.high %v129_v60, %v129_v60  ;;  %v1308_v5 = vcombine.low %v129_v60, %v129_v60  ;;  %v1279_v9 = vcombine.high %v98_v2, %v102_v3 }
  0x68   :  { %393 = vmatpush1.bf16.msra.mxu0 %v1290_v23  ;;  %522 = vmatpush1.bf16.msra.mxu1 %v1296_v34  ;;  %v106_v6 = vld [vmem:[#allocation5 + $0x50] sm:$0xff]  ;;  %v1278_v10 = vcombine.low %v98_v2, %v102_v3  ;;  %v1458_v27 = vld [vmem:[#allocation8 + $0x110] ss:$8 sps:$4 sm:$0xff]   ;;  %v1475_v34 = vld [vmem:[#allocation8 + $0x154] ss:$8 sps:$4 sm:$0xff]  }
  0x69   :  { %394 = vmatprep.subr.bf16.mxu0 %v1299_v24  ;;  %523 = vmatprep.subr.bf16.mxu1 %v1305_v36  ;;  %v110_v7 = vld [vmem:[#allocation5 + $0x70] sm:$0xff]  ;;  %v371_v8 = vsel %vm363_vm0, %v1308_v5, 0  ;;  %v1473_v35 = vld [vmem:[#allocation8 + $0x150] ss:$8 sps:$4 sm:$0xff]   ;;  %v1490_v40 = vld [vmem:[#allocation8 + $0x34] ss:$8 sps:$4 sm:$0xff]  }
  0x6a   :  { %v114_v11 = vld [vmem:[#allocation5 + $0x90] sm:$0xff]  ;;  %v1287_v13 = vcombine.high %v106_v6, %v110_v7  ;;  %v1286_v14 = vcombine.low %v106_v6, %v110_v7  ;;  %v1488_v42 = vld [vmem:[#allocation8 + $0x30] ss:$8 sps:$4 sm:$0xff]   ;;  %v1502_v49 = vld [vmem:[#allocation8 + $0x54] ss:$8 sps:$4 sm:$0xff]  }
  0x6b   :  { %v118_v12 = vld [vmem:[#allocation5 + $0xb0] sm:$0xff]  ;;  %v1497_v47 = vld [vmem:[#allocation8 + $0x190] ss:$8 sps:$4 sm:$0xff]   ;;  %v1511_v53 = vld [vmem:[#allocation8 + $0x1b4] ss:$8 sps:$4 sm:$0xff]  }
  0x6c   :  { %395 = vmatpush1.bf16.msra.mxu0 %v1298_v30  ;;  %524 = vmatpush1.bf16.msra.mxu1 %v1304_v41  ;;  %v122_v15 = vld [vmem:[#allocation5 + $0xd0] sm:$0xff]  ;;  %v1295_v17 = vcombine.high %v114_v11, %v118_v12  ;;  %v1294_v18 = vcombine.low %v114_v11, %v118_v12  ;;  %v1466_v30 = vld [vmem:[#allocation8 + $0x134] ss:$8 sps:$4 sm:$0xff]   ;;  %v1524_v3 = vld [vmem:[#allocation8 + $0x90] ss:$8 sps:$4 sm:$0xff]  }
  0x6d   :  { %1314 = vmatprep.subr.msk.bf16.mxu0 %vm363_vm0, %v1307_v31  ;;  %1320 = vmatprep.subr.msk.bf16.mxu1 %vm363_vm0, %v1313_v43  ;;  %v126_v16 = vld [vmem:[#allocation5 + $0xf0] sm:$0xff]  ;;  %v1464_v31 = vld [vmem:[#allocation8 + $0x130] ss:$8 sps:$4 sm:$0xff]   ;;  %v1535_v6 = vld [vmem:[#allocation8 + $0x1f4] ss:$8 sps:$4 sm:$0xff]  }
  0x6e   :  { %v130_v19 = vld [vmem:[#allocation5 + $0x110] sm:$0xff]  ;;  %v1303_v20 = vcombine.high %v122_v15, %v126_v16  ;;  %v1302_v21 = vcombine.low %v122_v15, %v126_v16 }
  0x6f   :  { %v1311_v22 = vcombine.high %v130_v19, %v130_v19  ;;  %v1310_v23 = vcombine.low %v130_v19, %v130_v19  ;;  %v1457_v25 = vld [vmem:[#allocation8 + $0x104] ss:$8 sps:$4 sm:$0xff]   ;;  %v1461_v29 = vld [vmem:[#allocation8 + $0x120] ss:$8 sps:$4 sm:$0xff]  }
  0x70   :  { %397 = vmatpush1.bf16.msra.mxu0 %v365_v38  ;;  %526 = vmatpush1.bf16.msra.mxu1 %v383_v50  ;;  %v1463_v28 = vld [vmem:[#allocation8 + $0x124] ss:$8 sps:$4 sm:$0xff]   ;;  %v1467_v33 = vld [vmem:[#allocation8 + $0x140] ss:$8 sps:$4 sm:$0xff]   ;;  %v1487_v38 = vld [vmem:[#allocation8 + $0x174] ss:$8 sps:$4 sm:$0xff]  }
  0x71   :  { %431 = vmatprep.subr.bf16.mxu0 %v1277_v39  ;;  %984 = vmatprep.subr.bf16.mxu1 %v1472_v51  ;;  %v377_v24 = vsel %vm363_vm0, %v1310_v23, 0  ;;  %v1469_v32 = vld [vmem:[#allocation8 + $0x144] ss:$8 sps:$4 sm:$0xff]   ;;  %v1479_v37 = vld [vmem:[#allocation8 + $0x160] ss:$8 sps:$4 sm:$0xff]  }
  0x72   :  { %v1481_v36 = vld [vmem:[#allocation8 + $0x164] ss:$8 sps:$4 sm:$0xff]   ;;  %v1485_v39 = vld [vmem:[#allocation8 + $0x170] ss:$8 sps:$4 sm:$0xff]   ;;  %v1491_v43 = vld [vmem:[#allocation8 + $0x180] ss:$8 sps:$4 sm:$0xff]  }
  0x73   :  { %1315 = vmatmul.mubr.msk.bf16.vlgmr.msra.gmra.mrb[0].mxu0 %vm359_vm1, %v1833_v45  ;;  %1321 = vmatmul.mubr.msk.bf16.vlgmr.msra.gmra.mrb[0].mxu1 %vm359_vm1, %v1833_v45  ;;  %v1493_v41 = vld [vmem:[#allocation8 + $0x184] ss:$8 sps:$4 sm:$0xff]   ;;  %v1503_v50 = vld [vmem:[#allocation8 + $0x1a0] ss:$8 sps:$4 sm:$0xff]  }
  0x74   :  { %432 = vmatpush1.bf16.msra.mxu0 %v1276_v46  ;;  %463 = vmatprep.mubr.bf16.mxu0 %v1718_v0  ;;  %v1496_v44 = vld [vmem:[#allocation8 + $0x44] ss:$8 sps:$4 sm:$0xff]   ;;  %v1494_v46 = vld [vmem:[#allocation8 + $0x40] ss:$8 sps:$4 sm:$0xff]  }
  0x75   :  { %433 = vmatprep.subr.bf16.mxu0 %v1285_v48  ;;  %985 = vmatpush1.bf16.msra.mxu1 %v1470_v56  ;;  %v1500_v48 = vld [vmem:[#allocation8 + $0x50] ss:$8 sps:$4 sm:$0xff]   ;;  %v1505_v51 = vld [vmem:[#allocation8 + $0x1a4] ss:$8 sps:$4 sm:$0xff]   ;;  %v1506_v54 = vld [vmem:[#allocation8 + $0x60] ss:$8 sps:$4 sm:$0xff]  }
  0x76   :  { %986 = vmatprep.subr.bf16.mxu1 %v1478_v57  ;;  %v1514_v56 = vld [vmem:[#allocation8 + $0x74] ss:$8 sps:$4 sm:$0xff]   ;;  %v1517_v57 = vld [vmem:[#allocation8 + $0x1c4] ss:$8 sps:$4 sm:$0xff]   ;;  %v1530_v7 = vld [vmem:[#allocation8 + $0xa0] ss:$8 sps:$4 sm:$0xff]  }
  0x77   :  { %v1520_v60 = vld [vmem:[#allocation8 + $0x84] ss:$8 sps:$4 sm:$0xff]   ;;  %v1539_v12 = vld [vmem:[#allocation8 + $0xc0] ss:$8 sps:$4 sm:$0xff]  }
  0x78   :  { %434 = vmatpush1.bf16.msra.mxu0 %v1284_v52  ;;  %v1508_v52 = vld [vmem:[#allocation8 + $0x64] ss:$8 sps:$4 sm:$0xff]   ;;  %v1545_v16 = vld [vmem:[#allocation8 + $0xe0] ss:$8 sps:$4 sm:$0xff]  }
  0x79   :  { %435 = vmatprep.subr.bf16.mxu0 %v1293_v55  ;;  %987 = vmatpush1.bf16.msra.mxu1 %v1476_v58  ;;  %v1509_v55 = vld [vmem:[#allocation8 + $0x1b0] ss:$8 sps:$4 sm:$0xff]   ;;  %v1529_v2 = vld [vmem:[#allocation8 + $0x1e4] ss:$8 sps:$4 sm:$0xff]  }
  0x7a   :  { %988 = vmatprep.subr.bf16.mxu1 %v1484_v61  ;;  %v1512_v58 = vld [vmem:[#allocation8 + $0x70] ss:$8 sps:$4 sm:$0xff]   ;;  %v1523_v61 = vld [vmem:[#allocation8 + $0x1d4] ss:$8 sps:$4 sm:$0xff]   ;;  %v1532_v5 = vld [vmem:[#allocation8 + $0xa4] ss:$8 sps:$4 sm:$0xff]  }
  0x7b   :  { %v1541_v11 = vld [vmem:[#allocation8 + $0xc4] ss:$8 sps:$4 sm:$0xff]  }
  0x7c   :  { %436 = vmatpush1.bf16.msra.mxu0 %v1292_v59  ;;  %v1515_v59 = vld [vmem:[#allocation8 + $0x1c0] ss:$8 sps:$4 sm:$0xff]   ;;  %v1547_v15 = vld [vmem:[#allocation8 + $0xe4] ss:$8 sps:$4 sm:$0xff]  }
  0x7d   :  { %437 = vmatprep.subr.bf16.mxu0 %v1301_v62  ;;  %989 = vmatpush1.bf16.msra.mxu1 %v1482_v63  ;;  %v1518_v62 = vld [vmem:[#allocation8 + $0x80] ss:$8 sps:$4 sm:$0xff]   ;;  %v1521_v63 = vld [vmem:[#allocation8 + $0x1d0] ss:$8 sps:$4 sm:$0xff]  }
  0x7e   :  { %990 = vmatprep.subr.bf16.mxu1 %v1490_v40 }
  0x80   :  { %438 = vmatpush1.bf16.msra.mxu0 %v1300_v1  ;;  %v1526_v1 = vld [vmem:[#allocation8 + $0x94] ss:$8 sps:$4 sm:$0xff]  }
  0x81   :  { %1316 = vmatprep.subr.msk.bf16.mxu0 %vm363_vm0, %v1309_v4  ;;  %991 = vmatpush1.bf16.msra.mxu1 %v1488_v42  ;;  %v1527_v4 = vld [vmem:[#allocation8 + $0x1e0] ss:$8 sps:$4 sm:$0xff]  }
  0x82   :  { %992 = vmatprep.subr.bf16.mxu1 %v1496_v44 }
  0x84   :  { %440 = vmatpush1.bf16.msra.mxu0 %v371_v8  ;;  %v1533_v8 = vld [vmem:[#allocation8 + $0x1f0] ss:$8 sps:$4 sm:$0xff]  }
  0x85   :  { %474 = vmatprep.subr.bf16.mxu0 %v1279_v9  ;;  %993 = vmatpush1.bf16.msra.mxu1 %v1494_v46  ;;  %v1538_v9 = vld [vmem:[#allocation8 + $0xb4] ss:$8 sps:$4 sm:$0xff]  }
  0x86   :  { %994 = vmatprep.subr.bf16.mxu1 %v1502_v49 }
  0x87   :  { %1317 = vmatmul.mubr.msk.bf16.vlgmr.msra.gmra.mrb[4].mxu0 %vm359_vm1, %v1833_v45 }
  0x88   :  { %475 = vmatpush1.bf16.msra.mxu0 %v1278_v10  ;;  %506 = vmatprep.mubr.bf16.mxu0 %v1718_v0  ;;  %v1455_v0 = vld [vmem:[#allocation8 + $0x100] ss:$8 sps:$4 sm:$0xff]   ;;  %v1536_v10 = vld [vmem:[#allocation8 + $0xb0] ss:$8 sps:$4 sm:$0xff]  }
  0x89   :  { %476 = vmatprep.subr.bf16.mxu0 %v1287_v13  ;;  %995 = vmatpush1.bf16.msra.mxu1 %v1500_v48  ;;  %v1544_v13 = vld [vmem:[#allocation8 + $0xd4] ss:$8 sps:$4 sm:$0xff]  }
  0x8a   :  { %996 = vmatprep.subr.bf16.mxu1 %v1508_v52 }
  0x8c   :  { %477 = vmatpush1.bf16.msra.mxu0 %v1286_v14  ;;  %v1542_v14 = vld [vmem:[#allocation8 + $0xd0] ss:$8 sps:$4 sm:$0xff]  }
  0x8d   :  { %478 = vmatprep.subr.bf16.mxu0 %v1295_v17  ;;  %997 = vmatpush1.bf16.msra.mxu1 %v1506_v54  ;;  %v1550_v17 = vld [vmem:[#allocation8 + $0xf4] ss:$8 sps:$4 sm:$0xff]  }
  0x8e   :  { %998 = vmatprep.subr.bf16.mxu1 %v1514_v56 }
  0x90   :  { %479 = vmatpush1.bf16.msra.mxu0 %v1294_v18  ;;  %v1548_v18 = vld [vmem:[#allocation8 + $0xf0] ss:$8 sps:$4 sm:$0xff]  }
  0x91   :  { %480 = vmatprep.subr.bf16.mxu0 %v1303_v20  ;;  %999 = vmatpush1.bf16.msra.mxu1 %v1512_v58 }
  0x92   :  { %1000 = vmatprep.subr.bf16.mxu1 %v1520_v60 }
  0x94   :  { %481 = vmatpush1.bf16.msra.mxu0 %v1302_v21 }
  0x95   :  { %1318 = vmatprep.subr.msk.bf16.mxu0 %vm363_vm0, %v1311_v22  ;;  %1001 = vmatpush1.bf16.msra.mxu1 %v1518_v62  ;;  %v134_v22 = vlaneseq }
  0x96   :  { %1002 = vmatprep.subr.bf16.mxu1 %v1526_v1 }
  0x98   :  { %483 = vmatpush1.bf16.msra.mxu0 %v377_v24 }
  0x99   :  { %1027 = vmatprep.subr.bf16.mxu0 %v1457_v25  ;;  %1003 = vmatpush1.bf16.msra.mxu1 %v1524_v3 }
  0x9a   :  { %1004 = vmatprep.subr.bf16.mxu1 %v1532_v5 }
  0x9b   :  { %1319 = vmatmul.mubr.msk.bf16.vlgmr.msra.gmra.mrb[8].mxu0 %vm359_vm1, %v1833_v45  ;;  %v1499_v45 = vld [vmem:[#allocation8 + $0x194] ss:$8 sps:$4 sm:$0xff]  }
  0x9c   :  { %1028 = vmatpush1.bf16.msra.mxu0 %v1455_v0  ;;  %v1851_v0 = vshrl.u32 %v134_v22, 7 }
  0x9d   :  { %1029 = vmatprep.subr.bf16.mxu0 %v1460_v26  ;;  %1005 = vmatpush1.bf16.msra.mxu1 %v1530_v7 }
  0x9e   :  { %1006 = vmatprep.subr.bf16.mxu1 %v1538_v9  ;;  %v140_v1 = vsub.s32 1, %v1851_v0  ;;  %v156_v3 = vsub.s32 5, %v1851_v0 }
  0xa0   :  { %1030 = vmatpush1.bf16.msra.mxu0 %v1458_v27 }
  0xa1   :  { %1031 = vmatprep.subr.bf16.mxu0 %v1463_v28  ;;  %1007 = vmatpush1.bf16.msra.mxu1 %v1536_v10  ;;  %v160_v28 = vsub.s32 6, %v1851_v0 }
  0xa2   :  { %1008 = vmatprep.subr.bf16.mxu1 %v1541_v11 }
  0xa4   :  { %1032 = vmatpush1.bf16.msra.mxu0 %v1461_v29  ;;  %v164_v29 = vsub.s32 7, %v1851_v0 }
  0xa5   :  { %1033 = vmatprep.subr.bf16.mxu0 %v1466_v30  ;;  %1009 = vmatpush1.bf16.msra.mxu1 %v1539_v12  ;;  %v132_v30 = vld [vmem:[#allocation7] sm:$0xff] }
  0xa6   :  { %1010 = vmatprep.subr.bf16.mxu1 %v1544_v13  ;;  %v141_v5 = vrot.slane %v132_v30, %v140_v1  ;;  %v157_v7 = vrot.slane %v132_v30, %v156_v3 }
  0xa8   :  { %1034 = vmatpush1.bf16.msra.mxu0 %v1464_v31  ;;  %v144_v31 = vsub.s32 2, %v1851_v0 }
  0xa9   :  { %1035 = vmatprep.subr.bf16.mxu0 %v1469_v32  ;;  %1011 = vmatpush1.bf16.msra.mxu1 %v1542_v14  ;;  %v161_v32 = vrot.slane %v132_v30, %v160_v28 }
  0xaa   :  { %1012 = vmatprep.subr.bf16.mxu1 %v1547_v15 }
  0xac   :  { %1036 = vmatpush1.bf16.msra.mxu0 %v1467_v33  ;;  %v148_v33 = vsub.s32 3, %v1851_v0 }
  0xad   :  { %1037 = vmatprep.subr.bf16.mxu0 %v1475_v34  ;;  %1013 = vmatpush1.bf16.msra.mxu1 %v1545_v16  ;;  %v165_v34 = vrot.slane %v132_v30, %v164_v29 }
  0xae   :  { %1014 = vmatprep.subr.bf16.mxu1 %v1550_v17 }
  0xb0   :  { %1038 = vmatpush1.bf16.msra.mxu0 %v1473_v35  ;;  %v145_v35 = vrot.slane %v132_v30, %v144_v31 }
  0xb1   :  { %1039 = vmatprep.subr.bf16.mxu0 %v1481_v36  ;;  %1015 = vmatpush1.bf16.msra.mxu1 %v1548_v18 }
  0xb4   :  { %1040 = vmatpush1.bf16.msra.mxu0 %v1479_v37  ;;  %v149_v37 = vrot.slane %v132_v30, %v148_v33 }
  0xb5   :  { %1041 = vmatprep.subr.bf16.mxu0 %v1487_v38 }
  0xb8   :  { %1042 = vmatpush1.bf16.msra.mxu0 %v1485_v39 }
  0xb9   :  { %1043 = vmatprep.subr.bf16.mxu0 %v1493_v41 }
  0xbc   :  { %1044 = vmatpush1.bf16.msra.mxu0 %v1491_v43 }
  0xbd   :  { %1045 = vmatprep.subr.bf16.mxu0 %v1499_v45 }
  0xc0   :  { %1046 = vmatpush1.bf16.msra.mxu0 %v1497_v47 }
  0xc1   :  { %1047 = vmatprep.subr.bf16.mxu0 %v1505_v51 }
  0xc4   :  { %1048 = vmatpush1.bf16.msra.mxu0 %v1503_v50 }
  0xc5   :  { %1049 = vmatprep.subr.bf16.mxu0 %v1511_v53 }
  0xc8   :  { %1050 = vmatpush1.bf16.msra.mxu0 %v1509_v55 }
  0xc9   :  { %1051 = vmatprep.subr.bf16.mxu0 %v1517_v57 }
  0xcc   :  { %1052 = vmatpush1.bf16.msra.mxu0 %v1515_v59 }
  0xcd   :  { %1053 = vmatprep.subr.bf16.mxu0 %v1523_v61 }
  0xd0   :  { %1054 = vmatpush1.bf16.msra.mxu0 %v1521_v63  ;;  %v136_v63 = vsub.s32 0, %v1851_v0 }
  0xd1   :  { %1055 = vmatprep.subr.bf16.mxu0 %v1529_v2  ;;  %v152_v2 = vsub.s32 4, %v1851_v0 }
  0xd4   :  { %1056 = vmatpush1.bf16.msra.mxu0 %v1527_v4  ;;  %v137_v4 = vrot.slane %v132_v30, %v136_v63 }
  0xd5   :  { %1057 = vmatprep.subr.bf16.mxu0 %v1535_v6  ;;  %v153_v6 = vrot.slane %v132_v30, %v152_v2 }
  0xd8   :  { %1058 = vmatpush1.bf16.msra.mxu0 %v1533_v8 }
 0x146   :  { %v422_v19 = vpop.f32.mrb[0].mxu0  ;;  %v551_v24 = vpop.f32.mrb[0].mxu1 }
 0x147   :  { %v424_v20 = vpop.f32.mrb[1].mxu0  ;;  %v553_v25 = vpop.f32.mrb[1].mxu1  ;;  %v552_v36 = vadd.f32 %v551_v24, %v161_v32  ;;  %v423_v8 = vadd.f32 %v422_v19, %v137_v4 }
 0x148   :  { %v426_v21 = vpop.f32.mrb[2].mxu0  ;;  %v555_v26 = vpop.f32.mrb[2].mxu1  ;;  %v554_v38 = vadd.f32 %v553_v25, %v165_v34  ;;  %v425_v9 = vadd.f32 %v424_v20, %v141_v5 }
 0x149   :  { %v428_v23 = vpop.f32.mrb[3].mxu0  ;;  %v557_v27 = vpop.f32.mrb[3].mxu1  ;;  %v556_v39 = vadd.f32 %v555_v26, %v161_v32  ;;  %v566_v43 = vmax.f32 %v552_v36, 0.0  ;;  %v427_v11 = vadd.f32 %v426_v21, %v137_v4  ;;  %v560_v17 = vmax.f32 %v423_v8, 0.0  ;;  %v1553_v36 = vld [vmem:[#allocation10 + $0x48] sm:$0xff]  }
 0x14a   :  { %v558_v41 = vadd.f32 %v557_v27, %v165_v34  ;;  %v567_v46 = vmax.f32 %v554_v38, 0.0  ;;  %v429_v14 = vadd.f32 %v428_v23, %v141_v5  ;;  %v561_v25 = vmax.f32 %v425_v9, 0.0  ;;  %v1551_v23 = vld [vmem:[#allocation10 + $0x40] sm:$0xff]   ;;  %v1555_v38 = vld [vmem:[#allocation10 + $0x50] sm:$0xff]  }
 0x14b   :  { %v574_v50 = vmax.f32 %v556_v39, 0.0  ;;  %v568_v28 = vmax.f32 %v427_v11, 0.0  ;;  %1403 = vmatprep.subr.bf16.mxu1 %v1551_v23  ;;  %v1556_v39 = vld [vmem:[#allocation10 + $0x10] sm:$0xff]  }
 0x14c   :  { %v575_v54 = vmax.f32 %v558_v41, 0.0  ;;  %v569_v30 = vmax.f32 %v429_v14, 0.0  ;;  %v1558_v41 = vld [vmem:[#allocation10 + $0x18] sm:$0xff]  }
 0x15a   :  { %v465_v40 = vpop.f32.mrb[4].mxu0 }
 0x15b   :  { %v466_v42 = vadd.f32 %v465_v40, %v145_v35  ;;  %v467_v44 = vpop.f32.mrb[5].mxu0  ;;  %v1557_v40 = vld [vmem:[#allocation10 + $0x58] sm:$0xff]  }
 0x15c   :  { %v468_v45 = vadd.f32 %v467_v44, %v149_v37  ;;  %v469_v47 = vpop.f32.mrb[6].mxu0  ;;  %v1561_v44 = vld [vmem:[#allocation10 + $0x68] sm:$0xff]  }
 0x15d   :  { %v562_v48 = vmax.f32 %v466_v42, 0.0  ;;  %v470_v49 = vadd.f32 %v469_v47, %v145_v35  ;;  %v471_v51 = vpop.f32.mrb[7].mxu0  ;;  %v1552_v35 = vld [vmem:[#allocation10] sm:$0xff]   ;;  %v1564_v47 = vld [vmem:[#allocation10 + $0x30] sm:$0xff]  }
 0x15e   :  { %v563_v52 = vmax.f32 %v468_v45, 0.0  ;;  %v472_v53 = vadd.f32 %v471_v51, %v149_v37  ;;  %v1554_v37 = vld [vmem:[#allocation10 + $0x8] sm:$0xff]   ;;  %v1559_v42 = vld [vmem:[#allocation10 + $0x60] sm:$0xff]  }
 0x15f   :  { %v578_v55 = vmax.f32 %v562_v48, %v566_v43  ;;  %v570_v56 = vmax.f32 %v470_v49, 0.0  ;;  %v1560_v43 = vld [vmem:[#allocation10 + $0x20] sm:$0xff]   ;;  %v1562_v45 = vld [vmem:[#allocation10 + $0x28] sm:$0xff]   ;;  %v1565_v48 = vld [vmem:[#allocation10 + $0x78] sm:$0xff]  }
 0x160   :  { %v579_v57 = vmax.f32 %v563_v52, %v567_v46  ;;  %v571_v58 = vmax.f32 %v472_v53, 0.0  ;;  %v1563_v46 = vld [vmem:[#allocation10 + $0x70] sm:$0xff]   ;;  %v1566_v49 = vld [vmem:[#allocation10 + $0x38] sm:$0xff]  }
 0x161   :  { %v582_v59 = vmax.f32 %v570_v56, %v574_v50 }
 0x162   :  { %v583_v60 = vmax.f32 %v571_v58, %v575_v54  ;;  %v652_v54 = vld [vmem:[%s1894_s4] sm:$0x3] }
 0x163   :  { %v586_v61 = vpack.c.bf16 %v582_v59, %v578_v55  ;;  %v657_v55 = vrot.slane %v652_v54, %v136_v63  ;;  %v661_v56 = vrot.slane %v652_v54, %v140_v1  ;;  %v1386_v1 = vld [vmem:[%s1896_s6] ss:$0 sm:$0xff] }
 0x164   :  { %v587_v62 = vpack.c.bf16 %v583_v60, %v579_v57 }
 0x166   :  { %1059 = vmatprep.mubr.bf16.mxu0 %v587_v62 }
 0x167   :  { %1060 = vmatmul.mubr.bf16.vlgmr.msra.gmra.mrb[12].mxu0 %v586_v61 }
 0x16e   :  { %v508_v10 = vpop.f32.mrb[8].mxu0 }
 0x16f   :  { %v509_v12 = vadd.f32 %v508_v10, %v153_v6  ;;  %v510_v13 = vpop.f32.mrb[9].mxu0 }
 0x170   :  { %v511_v15 = vadd.f32 %v510_v13, %v157_v7  ;;  %v512_v16 = vpop.f32.mrb[10].mxu0 }
 0x171   :  { %v564_v18 = vmax.f32 %v509_v12, 0.0  ;;  %v513_v22 = vadd.f32 %v512_v16, %v153_v6  ;;  %v514_v24 = vpop.f32.mrb[11].mxu0 }
 0x172   :  { %v565_v26 = vmax.f32 %v511_v15, 0.0  ;;  %v515_v27 = vadd.f32 %v514_v24, %v157_v7 }
 0x173   :  { %v576_v29 = vmax.f32 %v560_v17, %v564_v18  ;;  %v572_v31 = vmax.f32 %v513_v22, 0.0 }
 0x174   :  { %v577_v19 = vmax.f32 %v561_v25, %v565_v26  ;;  %v573_v20 = vmax.f32 %v515_v27, 0.0 }
 0x175   :  { %v580_v32 = vmax.f32 %v568_v28, %v572_v31 }
 0x176   :  { %v581_v21 = vmax.f32 %v569_v30, %v573_v20 }
 0x177   :  { %v584_v33 = vpack.c.bf16 %v580_v32, %v576_v29 }
 0x178   :  { %v585_v34 = vpack.c.bf16 %v581_v21, %v577_v19 }
 0x17a   :  { %1016 = vmatprep.mubr.bf16.mxu1 %v585_v34 }
 0x17b   :  { %1017 = vmatmul.mubr.bf16.vlgmr.msra.gmra.mrb[4].mxu1 %v584_v33 }
 0x17c   :  { %1404 = vmatpush3.bf16.msra.mxu1 %v1552_v35 }
 0x17d   :  { %1405 = vmatprep.subr.bf16.mxu1 %v1553_v36 }
 0x180   :  { %1406 = vmatpush3.bf16.msra.mxu1 %v1554_v37 }
 0x181   :  { %1407 = vmatprep.subr.bf16.mxu1 %v1555_v38 }
 0x184   :  { %1408 = vmatpush3.bf16.msra.mxu1 %v1556_v39 }
 0x185   :  { %1409 = vmatprep.subr.bf16.mxu1 %v1557_v40 }
 0x188   :  { %1410 = vmatpush3.bf16.msra.mxu1 %v1558_v41 }
 0x189   :  { %1411 = vmatprep.subr.bf16.mxu1 %v1559_v42 }
 0x18c   :  { %1412 = vmatpush3.bf16.msra.mxu1 %v1560_v43 }
 0x18d   :  { %1413 = vmatprep.subr.bf16.mxu1 %v1561_v44 }
 0x190   :  { %1414 = vmatpush3.bf16.msra.mxu1 %v1562_v45 }
 0x191   :  { %1415 = vmatprep.subr.bf16.mxu1 %v1563_v46 }
 0x194   :  { %1416 = vmatpush3.bf16.msra.mxu1 %v1564_v47 }
 0x195   :  { %1417 = vmatprep.subr.bf16.mxu1 %v1565_v48 }
 0x198   :  { %1418 = vmatpush3.bf16.msra.mxu1 %v1566_v49 }
 0x23a   :  { %v1061_v50 = vpop.f32.mrb[12].mxu0 }
 0x23b   :  { %v1063_v51 = vpop.f32.mrb[13].mxu0 }
 0x23c   :  { %v1065_v52 = vpop.f32.mrb[14].mxu0 }
 0x23d   :  { %v1067_v53 = vpop.f32.mrb[15].mxu0 }
 0x24e   :  { %v1018_v57 = vpop.f32.mrb[4].mxu1 }
 0x24f   :  { %v1019_v58 = vadd.f32 %v1018_v57, %v657_v55  ;;  %v1020_v59 = vpop.f32.mrb[5].mxu1 }
 0x250   :  { %v1021_v60 = vadd.f32 %v1020_v59, %v661_v56  ;;  %v1022_v61 = vpop.f32.mrb[6].mxu1 }
 0x251   :  { %v1062_v62 = vadd.f32 %v1061_v50, %v1019_v58  ;;  %v1023_v2 = vadd.f32 %v1022_v61, %v657_v55  ;;  %v1024_v3 = vpop.f32.mrb[7].mxu1 }
 0x252   :  { %v1064_v4 = vadd.f32 %v1063_v51, %v1021_v60  ;;  %v1025_v5 = vadd.f32 %v1024_v3, %v661_v56 }
 0x253   :  { %v1066_v6 = vadd.f32 %v1065_v52, %v1023_v2  ;;  %v1070_v8 = vmax.f32 %v1062_v62, 0.0 }
 0x254   :  { %v1068_v7 = vadd.f32 %v1067_v53, %v1025_v5  ;;  %v1071_v10 = vmax.f32 %v1064_v4, 0.0 }
 0x255   :  { %v1072_v9 = vmax.f32 %v1066_v6, 0.0 }
 0x256   :  { %v1073_v11 = vmax.f32 %v1068_v7, 0.0 }
 0x257   :  { %v1074_v63 = vpack.c.bf16 %v1072_v9, %v1070_v8 }
 0x258   :  { %v1075_v12 = vpack.c.bf16 %v1073_v11, %v1071_v10 }
 0x25a   :  { %1243 = vmatprep.mubr.bf16.mxu1 %v1075_v12 }
 0x25b   :  { %1244 = vmatmul.mubr.bf16.vlgmr.msra.gmra.mrb[8].mxu1 %v1074_v63 }
 0x32e   :  { %v1419_v0 = vpop.f32.mrb[8].mxu1 }
 0x32f   :  { %v1420_v13 = vpop.f32.mrb[9].mxu1 }
 0x330   :  { %v1421_v14 = vadd.f32 %v1420_v13, %v1419_v0  ;;  %v1422_v15 = vpop.f32.mrb[10].mxu1 }
 0x331   :  { %v1423_v16 = vpop.f32.mrb[11].mxu1 }
 0x332   :  { %v1246_v17 = vadd.f32 %v1421_v14, %v1386_v1  ;;  %v1424_v18 = vadd.f32 %v1423_v16, %v1422_v15 }
 0x334   :  { %1252 = vst [vmem:[#allocation11] sm:$0xff] %v1246_v17  ;;  %v1249_v22 = vadd.f32 %v1424_v18, %v1386_v1 }
 0x336   :  { %1253 = vst [vmem:[#allocation11 + $0x8] sm:$0xff] %v1249_v22 }
 0x337   :  { %1688 = shalt.err (!%p1685_p2)
}
 0x338   :  { %s1689_s23 = scalar_lea.hbm %s1897_s7, 256 }
 0x339   :  { %p1690_p3 = scmp.ne.s32.totalorder %s1897_s7, %s1689_s23  ;;  %p1693_p4 = scmp.lt.u32.totalorder %s1689_s23, %s1897_s7 }
 0x33b   :  { %p1695_p5 = pnand %p1693_p4, %p1690_p3 }
 0x33d   :  { %1698 = shalt.err (!%p1695_p5)
}
 0x33e   :  { %1265 = dma.vmem_to_hbm [thread:$0]  %s1260_s20, 256, %s1897_s7, [#allocation4], %s1711_s1, %s1711_s1, %s1712_s25  }
 0x33f   :  { %1705 = dma.done.wait [#allocation4], 256  }
 0x340   :  { %1706 = vsyncadd [#allocation4], 4294967040 }
 0x341   :  { %1269 = vsyncpa [#allocation3], 1 }
 0x342   :  { %1270 = vsyncpa [#allocation6], 1 }
 0x343   :  { %1271 = vsyncpa [#allocation9], 1 }
 0x344   :  { %1272 = vsyncpa [#allocation4], 1 }

</bundles_post_ra>
